<compile_context>
chip_gen: v6e
topology: v6e:2x2x1
jax: 0.10.0
libtpu: 0.0.40
codegen_flags: <defaults>
</compile_context>

<pallas_src>
import jax
import jax.numpy as jnp
from jax.experimental import pallas as pl
from jax.experimental.pallas import tpu as pltpu

EPS = 1e-5
_LANE = 128
_SUBLANE = 8


def _round_up(x, m):
    return ((x + m - 1) // m) * m


# --------------------------- in-kernel helpers ------------------------------
def _make_halo(z, Bt, H, W, Cp):
    """Zero halo (padding=1) around (Bt,H,W,Cp); width rounded up to a multiple
    of 8 sublanes with never-read zero columns on the right."""
    cdt = z.dtype
    Wh = _round_up(W + 2, _SUBLANE)
    zl = jnp.zeros((Bt, H, 1, Cp), cdt)
    zr = jnp.zeros((Bt, H, Wh - W - 1, Cp), cdt)
    z = jnp.concatenate([zl, z, zr], axis=2)           # (Bt, H, Wh, Cp)
    zrow = jnp.zeros((Bt, 1, Wh, Cp), cdt)
    return jnp.concatenate([zrow, z, zrow], axis=1)    # (Bt, H+2, Wh, Cp)


def _conv3x3(zpad, w_ref, Bt, H, W, Cp):
    """3x3 conv as 9 per-tap MXU matmuls with f32 accumulation.

    zpad : (Bt, H+2, Wh, Cp) zero-haloed block, compute dtype.
    w_ref: (3, 3, Cp, Cp) ref, [dy, dx, cin, cout], compute dtype.
    The sublane-shifted W slice happens once per dx; dy taps are cheap
    outer-dim row slices. Returns f32 (Bt*H*W, Cp).
    """
    HW = Bt * H * W
    acc = None
    for dx in range(3):
        xslab = zpad[:, :, dx:dx + W, :]               # (Bt, H+2, W, Cp)
        for dy in range(3):
            xtap = xslab[:, dy:dy + H, :, :].reshape(HW, Cp)
            part = jnp.dot(xtap, w_ref[dy, dx],
                           preferred_element_type=jnp.float32)
            acc = part if acc is None else acc + part
    return acc


def _partial_stats(acc):
    # per-channel sum / sum-of-squares over this block's positions (f32)
    s = jnp.sum(acc, axis=0, keepdims=True)
    ss = jnp.sum(acc * acc, axis=0, keepdims=True)
    return jnp.concatenate([s, ss], axis=0)            # (2, Cp)


# ------------------------------- kernels ------------------------------------
def _conv1_kernel(x_ref, w_ref, y_ref, stats_ref):
    # x_ref: (Bt, H, W, Cp) f32   w_ref: (3, 3, Cp, Cp) cdt
    # y_ref: (Bt, H, W, Cp) cdt   stats_ref: (1, 2, Cp) f32
    Bt, H, W, Cp = x_ref.shape
    cdt = w_ref.dtype
    z = x_ref[...].astype(cdt)
    zpad = _make_halo(z, Bt, H, W, Cp)
    acc = _conv3x3(zpad, w_ref, Bt, H, W, Cp)
    y_ref[...] = acc.reshape(Bt, H, W, Cp).astype(y_ref.dtype)
    stats_ref[...] = _partial_stats(acc).reshape(1, 2, Cp)


def _conv2_kernel(y1_ref, scale_ref, shift_ref, w_ref, y2_ref, stats_ref):
    # bn1 affine + relu applied on the fly (f32), then conv2 + bn2 partials.
    Bt, H, W, Cp = y1_ref.shape
    cdt = w_ref.dtype
    y1 = y1_ref[...].astype(jnp.float32)
    z = jnp.maximum(y1 * scale_ref[...] + shift_ref[...], 0.0).astype(cdt)
    zpad = _make_halo(z, Bt, H, W, Cp)
    acc = _conv3x3(zpad, w_ref, Bt, H, W, Cp)
    y2_ref[...] = acc.reshape(Bt, H, W, Cp).astype(y2_ref.dtype)
    stats_ref[...] = _partial_stats(acc).reshape(1, 2, Cp)


def _bn2_residual_kernel(y2_ref, x_ref, scale_ref, shift_ref, out_ref):
    # out = relu(bn2(conv2_out) + residual); residual is the same channel-padded
    # x array that fed pass 1 (no second copy of x in HBM).
    y2 = y2_ref[...].astype(jnp.float32)
    r = x_ref[...].astype(jnp.float32)
    out = jnp.maximum(y2 * scale_ref[...] + shift_ref[...] + r, 0.0)
    out_ref[...] = out.astype(out_ref.dtype)


# ------------------------------- wrapper -------------------------------------
def _finalize_bn(stats, gamma_p, beta_p, n):
    """Reduce per-block (sum, sumsq) partials -> per-channel affine (scale, shift).

    bn(x) = (x - mean) * rsqrt(var + eps) * gamma + beta = x * scale + shift
    (training-mode batch statistics, biased variance, f32 throughout).
    """
    s = jnp.sum(stats[:, 0, :], axis=0)
    ss = jnp.sum(stats[:, 1, :], axis=0)
    mean = s / n
    var = jnp.maximum(ss / n - mean * mean, 0.0)
    inv = jax.lax.rsqrt(var + EPS)
    scale = gamma_p * inv
    shift = beta_p - mean * scale
    Cp = scale.shape[0]
    return (scale.reshape(1, Cp).astype(jnp.float32),
            shift.reshape(1, Cp).astype(jnp.float32))


def _prep_weight(w, Cp, cdt):
    # torch (Cout, Cin, 3, 3) -> (3 [dy], 3 [dx], Cp [cin], Cp [cout])
    C_out, C_in = w.shape[0], w.shape[1]
    wt = jnp.transpose(w.astype(jnp.float32), (2, 3, 1, 0))     # (3,3,Cin,Cout)
    wt = jnp.pad(wt, ((0, 0), (0, 0), (0, Cp - C_in), (0, Cp - C_out)))
    return wt.astype(cdt)


def _pad_vec(v, Cp):
    return jnp.pad(v.astype(jnp.float32), (0, Cp - v.shape[0]))


def _pick_batch_tile(B, per_image_bytes, target_bytes=2 << 20):
    """Largest divisor of B that keeps ~target_bytes of activation per block
    while leaving at least min(B, 4) grid steps for pipelining / megacore."""
    by_budget = max(1, target_bytes // max(per_image_bytes, 1))
    min_steps = min(B, 4)
    by_steps = max(1, B // min_steps)
    cap = int(min(B, by_budget, by_steps))
    for bt in range(cap, 0, -1):
        if B % bt == 0:
            return bt
    return 1


def basic_block_pallas_nhwc(x_p, w1, w2, g1, b1, g2, b2, *,
                            compute_dtype=jnp.bfloat16, batch_tile=None):
    """Core BasicBlock on channel-padded NHWC activations.

    x_p : (B, H, W, Cp) f32, Cp a multiple of 128, padded channels == 0.
    w1/w2: torch-layout (Cout, Cin, 3, 3); g*/b*: (C,) BN gamma/beta.
    Returns (B, H, W, Cp) f32 with padded channels == 0, so consecutive
    BasicBlocks can chain on this function without re-padding/transposing.
    """
    B, H, W, Cp = x_p.shape
    n = B * H * W
    cdt = compute_dtype

    w1t = _prep_weight(w1, Cp, cdt)
    w2t = _prep_weight(w2, Cp, cdt)
    g1p, b1p, g2p, b2p = (_pad_vec(v, Cp) for v in (g1, b1, g2, b2))

    per_image = H * W * Cp * 4
    Bt = batch_tile if batch_tile is not None else _pick_batch_tile(B, per_image)
    if B % Bt != 0:
        raise ValueError(f"batch_tile {Bt} must divide batch {B}")
    G = B // Bt

    params = pltpu.CompilerParams(
        dimension_semantics=("parallel",),
        vmem_limit_bytes=32 * 1024 * 1024,   # above v5e's 16 MiB scoped default
    )

    img = lambda i: (i, 0, 0, 0)
    stat = lambda i: (i, 0, 0)
    cw = lambda i: (0, 0, 0, 0)
    cv = lambda i: (0, 0)

    img_spec = pl.BlockSpec((Bt, H, W, Cp), img)
    w_spec = pl.BlockSpec((3, 3, Cp, Cp), cw)
    vec_spec = pl.BlockSpec((1, Cp), cv)
    stat_spec = pl.BlockSpec((1, 2, Cp), stat)
    act_shape = jax.ShapeDtypeStruct((B, H, W, Cp), cdt)
    stat_shape = jax.ShapeDtypeStruct((G, 2, Cp), jnp.float32)

    # ---- pass 1: conv1 (+ in-kernel halo) + bn1 partial statistics ----
    y1, stats1 = pl.pallas_call(
        _conv1_kernel,
        grid=(G,),
        in_specs=[img_spec, w_spec],
        out_specs=[img_spec, stat_spec],
        out_shape=[act_shape, stat_shape],
        compiler_params=params,
    )(x_p, w1t)

    scale1, shift1 = _finalize_bn(stats1, g1p, b1p, n)

    # ---- pass 2: bn1 affine + relu + conv2 + bn2 partial statistics ----
    y2, stats2 = pl.pallas_call(
        _conv2_kernel,
        grid=(G,),
        in_specs=[img_spec, vec_spec, vec_spec, w_spec],
        out_specs=[img_spec, stat_spec],
        out_shape=[act_shape, stat_shape],
        compiler_params=params,
    )(y1, scale1, shift1, w2t)

    scale2, shift2 = _finalize_bn(stats2, g2p, b2p, n)

    # ---- pass 3: bn2 affine + residual add + relu (residual = x_p itself) ----
    out = pl.pallas_call(
        _bn2_residual_kernel,
        grid=(G,),
        in_specs=[img_spec, img_spec, vec_spec, vec_spec],
        out_specs=img_spec,
        out_shape=jax.ShapeDtypeStruct((B, H, W, Cp), jnp.float32),
        compiler_params=params,
    )(y2, x_p, scale2, shift2)

    return out


def basic_block_pallas(x_nchw, w1, w2, g1, b1, g2, b2, *,
                       compute_dtype=jnp.bfloat16, batch_tile=None):
    """Thin NCHW adapter. For stacked BasicBlocks, hoist the transposes/pad and
    call basic_block_pallas_nhwc directly on channel-padded NHWC activations."""
    B, C, H, W = x_nchw.shape
    Cp = _round_up(C, _LANE)
    x_nhwc = jnp.transpose(x_nchw, (0, 2, 3, 1)).astype(jnp.float32)
    x_p = jnp.pad(x_nhwc, ((0, 0), (0, 0), (0, 0), (0, Cp - C)))
    out_p = basic_block_pallas_nhwc(x_p, w1, w2, g1, b1, g2, b2,
                                    compute_dtype=compute_dtype,
                                    batch_tile=batch_tile)
    return jnp.transpose(out_p[:, :, :, :C], (0, 3, 1, 2))


# ---------------- pure-JAX reference (for correctness check) ----------------
def _bn_train_ref(x_nchw, gamma, beta):
    mean = jnp.mean(x_nchw, axis=(0, 2, 3), keepdims=True)
    var = jnp.mean((x_nchw - mean) ** 2, axis=(0, 2, 3), keepdims=True)
    g = gamma.reshape(1, -1, 1, 1)
    b = beta.reshape(1, -1, 1, 1)
    return (x_nchw - mean) * jax.lax.rsqrt(var + EPS) * g + b


def basic_block_ref(x, w1, w2, g1, b1, g2, b2):
    dn = ("NCHW", "OIHW", "NCHW")
    out = jax.lax.conv_general_dilated(x, w1, (1, 1), ((1, 1), (1, 1)),
                                       dimension_numbers=dn)
    out = jnp.maximum(_bn_train_ref(out, g1, b1), 0.0)
    out = jax.lax.conv_general_dilated(out, w2, (1, 1), ((1, 1), (1, 1)),
                                       dimension_numbers=dn)
    out = _bn_train_ref(out, g2, b2)
    return jnp.maximum(out + x, 0.0)


if __name__ == "__main__":
    B, C, H, W = 2, 4, 16, 16   # inplanes == planes == 4, stride=1, downsample=None
    key = jax.random.PRNGKey(0)
    kx, k1, k2, kg1, kb1, kg2, kb2 = jax.random.split(key, 7)

    x = jax.random.normal(kx, (B, C, H, W), jnp.float32)
    w1 = 0.2 * jax.random.normal(k1, (C, C, 3, 3), jnp.float32)
    w2 = 0.2 * jax.random.normal(k2, (C, C, 3, 3), jnp.float32)
    g1 = 1.0 + 0.1 * jax.random.normal(kg1, (C,), jnp.float32)
    b1 = 0.1 * jax.random.normal(kb1, (C,), jnp.float32)
    g2 = 1.0 + 0.1 * jax.random.normal(kg2, (C,), jnp.float32)
    b2 = 0.1 * jax.random.normal(kb2, (C,), jnp.float32)

    ref = jax.block_until_ready(basic_block_ref(x, w1, w2, g1, b1, g2, b2))

    # default path: bf16 MXU operands / bf16 stored intermediates, f32 stats+acc
    out_bf16 = jax.block_until_ready(
        basic_block_pallas(x, w1, w2, g1, b1, g2, b2))
    assert out_bf16.shape == (B, C, H, W)
    assert jnp.allclose(out_bf16, ref, rtol=5e-2, atol=5e-2), "bf16 mismatch vs reference"

    # full-f32 path: tight match against the f32 reference
    out_f32 = jax.block_until_ready(
        basic_block_pallas(x, w1, w2, g1, b1, g2, b2, compute_dtype=jnp.float32))
    assert jnp.allclose(out_f32, ref, rtol=1e-3, atol=1e-3), "f32 mismatch vs reference"

    print("KERNEL_OK")
</pallas_src>

<mosaic_0001>
module attributes {stable_mosaic.version = 11 : i64} {
  func.func @_conv1_kernel(%arg0: i32, %arg1: memref<1x16x16x128xf32, #tpu.memory_space<vmem>>, %arg2: memref<3x3x128x128xbf16, #tpu.memory_space<vmem>>, %arg3: memref<1x16x16x128xbf16, #tpu.memory_space<vmem>>, %arg4: memref<1x2x128xf32, #tpu.memory_space<vmem>>) attributes {dimension_semantics = [#tpu.dimension_semantics<parallel>], iteration_bounds = array<i64: 2>, scalar_prefetch = 0 : i64, scratch_operands = 0 : i64, tpu.core_type = #tpu.core_type<tc>, window_params = [{transform_indices = @transform_0, window_bounds = array<i64: 1, 16, 16, 128>}, {pipeline_mode = #tpu.pipeline_mode<synchronous>, transform_indices = @transform_1, window_bounds = array<i64: 3, 3, 128, 128>}, {transform_indices = @transform_2, window_bounds = array<i64: 1, 16, 16, 128>}, {transform_indices = @transform_3, window_bounds = array<i64: 1, 2, 128>}]} {
    %c0 = arith.constant 0 : index
    %c0_0 = arith.constant 0 : index
    %c0_1 = arith.constant 0 : index
    %c0_2 = arith.constant 0 : index
    %0 = vector.load %arg1[%c0, %c0_0, %c0_1, %c0_2] : memref<1x16x16x128xf32, #tpu.memory_space<vmem>>, vector<1x16x16x128xf32>
    %1 = arith.truncf %0 : vector<1x16x16x128xf32> to vector<1x16x16x128xbf16>
    %cst = arith.constant 0.000000e+00 : bf16
    %2 = vector.broadcast %cst : bf16 to vector<1x16x1x128xbf16>
    %cst_3 = arith.constant 0.000000e+00 : bf16
    %3 = vector.broadcast %cst_3 : bf16 to vector<1x16x7x128xbf16>
    %4 = tpu.concatenate %2, %1, %3 in 2 : vector<1x16x1x128xbf16>, vector<1x16x16x128xbf16>, vector<1x16x7x128xbf16> -> vector<1x16x24x128xbf16>
    %cst_4 = arith.constant 0.000000e+00 : bf16
    %5 = vector.broadcast %cst_4 : bf16 to vector<1x1x24x128xbf16>
    %6 = tpu.concatenate %5, %4, %5 in 1 : vector<1x1x24x128xbf16>, vector<1x16x24x128xbf16>, vector<1x1x24x128xbf16> -> vector<1x18x24x128xbf16>
    %7 = vector.extract_strided_slice %6 {offsets = [0, 0, 0, 0], sizes = [1, 18, 16, 128], strides = [1, 1, 1, 1]} : vector<1x18x24x128xbf16> to vector<1x18x16x128xbf16>
    %8 = vector.extract_strided_slice %7 {offsets = [0, 0, 0, 0], sizes = [1, 16, 16, 128], strides = [1, 1, 1, 1]} : vector<1x18x16x128xbf16> to vector<1x16x16x128xbf16>
    %9 = vector.shape_cast %8 : vector<1x16x16x128xbf16> to vector<256x128xbf16>
    %c0_5 = arith.constant 0 : index
    %c0_6 = arith.constant 0 : index
    %c0_7 = arith.constant 0 : index
    %c0_8 = arith.constant 0 : index
    %10 = vector.load %arg2[%c0_5, %c0_6, %c0_7, %c0_8] : memref<3x3x128x128xbf16, #tpu.memory_space<vmem>>, vector<1x1x128x128xbf16>
    %11 = vector.shape_cast %10 : vector<1x1x128x128xbf16> to vector<128x128xbf16>
    %cst_9 = arith.constant dense<0.000000e+00> : vector<256x128xf32>
    %12 = tpu.matmul %9, %11, %cst_9 {dimension_numbers = #tpu.dot_dimension_numbers<[1], [0], [0], [1], [0, 0, 1, 1], [], []>} : vector<256x128xbf16>, vector<128x128xbf16>, vector<256x128xf32> -> vector<256x128xf32>
    %13 = vector.extract_strided_slice %7 {offsets = [0, 1, 0, 0], sizes = [1, 16, 16, 128], strides = [1, 1, 1, 1]} : vector<1x18x16x128xbf16> to vector<1x16x16x128xbf16>
    %14 = vector.shape_cast %13 : vector<1x16x16x128xbf16> to vector<256x128xbf16>
    %c1 = arith.constant 1 : index
    %c0_10 = arith.constant 0 : index
    %c0_11 = arith.constant 0 : index
    %c0_12 = arith.constant 0 : index
    %15 = vector.load %arg2[%c1, %c0_10, %c0_11, %c0_12] : memref<3x3x128x128xbf16, #tpu.memory_space<vmem>>, vector<1x1x128x128xbf16>
    %16 = vector.shape_cast %15 : vector<1x1x128x128xbf16> to vector<128x128xbf16>
    %cst_13 = arith.constant dense<0.000000e+00> : vector<256x128xf32>
    %17 = tpu.matmul %14, %16, %cst_13 {dimension_numbers = #tpu.dot_dimension_numbers<[1], [0], [0], [1], [0, 0, 1, 1], [], []>} : vector<256x128xbf16>, vector<128x128xbf16>, vector<256x128xf32> -> vector<256x128xf32>
    %18 = arith.addf %12, %17 : vector<256x128xf32>
    %19 = vector.extract_strided_slice %7 {offsets = [0, 2, 0, 0], sizes = [1, 16, 16, 128], strides = [1, 1, 1, 1]} : vector<1x18x16x128xbf16> to vector<1x16x16x128xbf16>
    %20 = vector.shape_cast %19 : vector<1x16x16x128xbf16> to vector<256x128xbf16>
    %c2 = arith.constant 2 : index
    %c0_14 = arith.constant 0 : index
    %c0_15 = arith.constant 0 : index
    %c0_16 = arith.constant 0 : index
    %21 = vector.load %arg2[%c2, %c0_14, %c0_15, %c0_16] : memref<3x3x128x128xbf16, #tpu.memory_space<vmem>>, vector<1x1x128x128xbf16>
    %22 = vector.shape_cast %21 : vector<1x1x128x128xbf16> to vector<128x128xbf16>
    %cst_17 = arith.constant dense<0.000000e+00> : vector<256x128xf32>
    %23 = tpu.matmul %20, %22, %cst_17 {dimension_numbers = #tpu.dot_dimension_numbers<[1], [0], [0], [1], [0, 0, 1, 1], [], []>} : vector<256x128xbf16>, vector<128x128xbf16>, vector<256x128xf32> -> vector<256x128xf32>
    %24 = arith.addf %18, %23 : vector<256x128xf32>
    %25 = vector.extract_strided_slice %6 {offsets = [0, 0, 1, 0], sizes = [1, 18, 16, 128], strides = [1, 1, 1, 1]} : vector<1x18x24x128xbf16> to vector<1x18x16x128xbf16>
    %26 = vector.extract_strided_slice %25 {offsets = [0, 0, 0, 0], sizes = [1, 16, 16, 128], strides = [1, 1, 1, 1]} : vector<1x18x16x128xbf16> to vector<1x16x16x128xbf16>
    %27 = vector.shape_cast %26 : vector<1x16x16x128xbf16> to vector<256x128xbf16>
    %c0_18 = arith.constant 0 : index
    %c1_19 = arith.constant 1 : index
    %c0_20 = arith.constant 0 : index
    %c0_21 = arith.constant 0 : index
    %28 = vector.load %arg2[%c0_18, %c1_19, %c0_20, %c0_21] : memref<3x3x128x128xbf16, #tpu.memory_space<vmem>>, vector<1x1x128x128xbf16>
    %29 = vector.shape_cast %28 : vector<1x1x128x128xbf16> to vector<128x128xbf16>
    %cst_22 = arith.constant dense<0.000000e+00> : vector<256x128xf32>
    %30 = tpu.matmul %27, %29, %cst_22 {dimension_numbers = #tpu.dot_dimension_numbers<[1], [0], [0], [1], [0, 0, 1, 1], [], []>} : vector<256x128xbf16>, vector<128x128xbf16>, vector<256x128xf32> -> vector<256x128xf32>
    %31 = arith.addf %24, %30 : vector<256x128xf32>
    %32 = vector.extract_strided_slice %25 {offsets = [0, 1, 0, 0], sizes = [1, 16, 16, 128], strides = [1, 1, 1, 1]} : vector<1x18x16x128xbf16> to vector<1x16x16x128xbf16>
    %33 = vector.shape_cast %32 : vector<1x16x16x128xbf16> to vector<256x128xbf16>
    %c1_23 = arith.constant 1 : index
    %c1_24 = arith.constant 1 : index
    %c0_25 = arith.constant 0 : index
    %c0_26 = arith.constant 0 : index
    %34 = vector.load %arg2[%c1_23, %c1_24, %c0_25, %c0_26] : memref<3x3x128x128xbf16, #tpu.memory_space<vmem>>, vector<1x1x128x128xbf16>
    %35 = vector.shape_cast %34 : vector<1x1x128x128xbf16> to vector<128x128xbf16>
    %cst_27 = arith.constant dense<0.000000e+00> : vector<256x128xf32>
    %36 = tpu.matmul %33, %35, %cst_27 {dimension_numbers = #tpu.dot_dimension_numbers<[1], [0], [0], [1], [0, 0, 1, 1], [], []>} : vector<256x128xbf16>, vector<128x128xbf16>, vector<256x128xf32> -> vector<256x128xf32>
    %37 = arith.addf %31, %36 : vector<256x128xf32>
    %38 = vector.extract_strided_slice %25 {offsets = [0, 2, 0, 0], sizes = [1, 16, 16, 128], strides = [1, 1, 1, 1]} : vector<1x18x16x128xbf16> to vector<1x16x16x128xbf16>
    %39 = vector.shape_cast %38 : vector<1x16x16x128xbf16> to vector<256x128xbf16>
    %c2_28 = arith.constant 2 : index
    %c1_29 = arith.constant 1 : index
    %c0_30 = arith.constant 0 : index
    %c0_31 = arith.constant 0 : index
    %40 = vector.load %arg2[%c2_28, %c1_29, %c0_30, %c0_31] : memref<3x3x128x128xbf16, #tpu.memory_space<vmem>>, vector<1x1x128x128xbf16>
    %41 = vector.shape_cast %40 : vector<1x1x128x128xbf16> to vector<128x128xbf16>
    %cst_32 = arith.constant dense<0.000000e+00> : vector<256x128xf32>
    %42 = tpu.matmul %39, %41, %cst_32 {dimension_numbers = #tpu.dot_dimension_numbers<[1], [0], [0], [1], [0, 0, 1, 1], [], []>} : vector<256x128xbf16>, vector<128x128xbf16>, vector<256x128xf32> -> vector<256x128xf32>
    %43 = arith.addf %37, %42 : vector<256x128xf32>
    %44 = vector.extract_strided_slice %6 {offsets = [0, 0, 2, 0], sizes = [1, 18, 16, 128], strides = [1, 1, 1, 1]} : vector<1x18x24x128xbf16> to vector<1x18x16x128xbf16>
    %45 = vector.extract_strided_slice %44 {offsets = [0, 0, 0, 0], sizes = [1, 16, 16, 128], strides = [1, 1, 1, 1]} : vector<1x18x16x128xbf16> to vector<1x16x16x128xbf16>
    %46 = vector.shape_cast %45 : vector<1x16x16x128xbf16> to vector<256x128xbf16>
    %c0_33 = arith.constant 0 : index
    %c2_34 = arith.constant 2 : index
    %c0_35 = arith.constant 0 : index
    %c0_36 = arith.constant 0 : index
    %47 = vector.load %arg2[%c0_33, %c2_34, %c0_35, %c0_36] : memref<3x3x128x128xbf16, #tpu.memory_space<vmem>>, vector<1x1x128x128xbf16>
    %48 = vector.shape_cast %47 : vector<1x1x128x128xbf16> to vector<128x128xbf16>
    %cst_37 = arith.constant dense<0.000000e+00> : vector<256x128xf32>
    %49 = tpu.matmul %46, %48, %cst_37 {dimension_numbers = #tpu.dot_dimension_numbers<[1], [0], [0], [1], [0, 0, 1, 1], [], []>} : vector<256x128xbf16>, vector<128x128xbf16>, vector<256x128xf32> -> vector<256x128xf32>
    %50 = arith.addf %43, %49 : vector<256x128xf32>
    %51 = vector.extract_strided_slice %44 {offsets = [0, 1, 0, 0], sizes = [1, 16, 16, 128], strides = [1, 1, 1, 1]} : vector<1x18x16x128xbf16> to vector<1x16x16x128xbf16>
    %52 = vector.shape_cast %51 : vector<1x16x16x128xbf16> to vector<256x128xbf16>
    %c1_38 = arith.constant 1 : index
    %c2_39 = arith.constant 2 : index
    %c0_40 = arith.constant 0 : index
    %c0_41 = arith.constant 0 : index
    %53 = vector.load %arg2[%c1_38, %c2_39, %c0_40, %c0_41] : memref<3x3x128x128xbf16, #tpu.memory_space<vmem>>, vector<1x1x128x128xbf16>
    %54 = vector.shape_cast %53 : vector<1x1x128x128xbf16> to vector<128x128xbf16>
    %cst_42 = arith.constant dense<0.000000e+00> : vector<256x128xf32>
    %55 = tpu.matmul %52, %54, %cst_42 {dimension_numbers = #tpu.dot_dimension_numbers<[1], [0], [0], [1], [0, 0, 1, 1], [], []>} : vector<256x128xbf16>, vector<128x128xbf16>, vector<256x128xf32> -> vector<256x128xf32>
    %56 = arith.addf %50, %55 : vector<256x128xf32>
    %57 = vector.extract_strided_slice %44 {offsets = [0, 2, 0, 0], sizes = [1, 16, 16, 128], strides = [1, 1, 1, 1]} : vector<1x18x16x128xbf16> to vector<1x16x16x128xbf16>
    %58 = vector.shape_cast %57 : vector<1x16x16x128xbf16> to vector<256x128xbf16>
    %c2_43 = arith.constant 2 : index
    %c2_44 = arith.constant 2 : index
    %c0_45 = arith.constant 0 : index
    %c0_46 = arith.constant 0 : index
    %59 = vector.load %arg2[%c2_43, %c2_44, %c0_45, %c0_46] : memref<3x3x128x128xbf16, #tpu.memory_space<vmem>>, vector<1x1x128x128xbf16>
    %60 = vector.shape_cast %59 : vector<1x1x128x128xbf16> to vector<128x128xbf16>
    %cst_47 = arith.constant dense<0.000000e+00> : vector<256x128xf32>
    %61 = tpu.matmul %58, %60, %cst_47 {dimension_numbers = #tpu.dot_dimension_numbers<[1], [0], [0], [1], [0, 0, 1, 1], [], []>} : vector<256x128xbf16>, vector<128x128xbf16>, vector<256x128xf32> -> vector<256x128xf32>
    %62 = arith.addf %56, %61 : vector<256x128xf32>
    %63 = vector.shape_cast %62 : vector<256x128xf32> to vector<1x16x16x128xf32>
    %64 = arith.truncf %63 : vector<1x16x16x128xf32> to vector<1x16x16x128xbf16>
    %c0_48 = arith.constant 0 : index
    %c0_49 = arith.constant 0 : index
    %c0_50 = arith.constant 0 : index
    %c0_51 = arith.constant 0 : index
    %65 = vector.load %arg3[%c0_48, %c0_49, %c0_50, %c0_51] : memref<1x16x16x128xbf16, #tpu.memory_space<vmem>>, vector<1x16x16x128xbf16>
    tpu.vector_store %arg3[%c0_48, %c0_49, %c0_50, %c0_51], %64 {strides = array<i32>} : memref<1x16x16x128xbf16, #tpu.memory_space<vmem>>, vector<1x16x16x128xbf16>,
    %cst_52 = arith.constant dense<0.000000e+00> : vector<128xf32>
    %66 = vector.multi_reduction <add>, %62, %cst_52 [0] : vector<256x128xf32> to vector<128xf32>
    %67 = vector.shape_cast %66 : vector<128xf32> to vector<1x128xf32>
    %68 = arith.mulf %62, %62 : vector<256x128xf32>
    %cst_53 = arith.constant dense<0.000000e+00> : vector<128xf32>
    %69 = vector.multi_reduction <add>, %68, %cst_53 [0] : vector<256x128xf32> to vector<128xf32>
    %70 = vector.shape_cast %69 : vector<128xf32> to vector<1x128xf32>
    %71 = tpu.concatenate %67, %70 in 0 : vector<1x128xf32>, vector<1x128xf32> -> vector<2x128xf32>
    %72 = vector.shape_cast %71 : vector<2x128xf32> to vector<1x2x128xf32>
    %c0_54 = arith.constant 0 : index
    %c0_55 = arith.constant 0 : index
    %c0_56 = arith.constant 0 : index
    %73 = vector.load %arg4[%c0_54, %c0_55, %c0_56] : memref<1x2x128xf32, #tpu.memory_space<vmem>>, vector<1x2x128xf32>
    tpu.vector_store %arg4[%c0_54, %c0_55, %c0_56], %72 {strides = array<i32>} : memref<1x2x128xf32, #tpu.memory_space<vmem>>, vector<1x2x128xf32>,
    return
  }
  func.func @transform_0(%arg0: i32) -> (i32, i32, i32, i32) {
    %c0_i32 = arith.constant 0 : i32
    %c0_i32_0 = arith.constant 0 : i32
    %c0_i32_1 = arith.constant 0 : i32
    %c0_i32_2 = arith.constant 0 : i32
    return %arg0, %c0_i32, %c0_i32_0, %c0_i32_1 : i32, i32, i32, i32
  }
  func.func @transform_1(%arg0: i32) -> (i32, i32, i32, i32) {
    %c0_i32 = arith.constant 0 : i32
    %c0_i32_0 = arith.constant 0 : i32
    %c0_i32_1 = arith.constant 0 : i32
    %c0_i32_2 = arith.constant 0 : i32
    %c0_i32_3 = arith.constant 0 : i32
    return %c0_i32, %c0_i32_0, %c0_i32_1, %c0_i32_2 : i32, i32, i32, i32
  }
  func.func @transform_2(%arg0: i32) -> (i32, i32, i32, i32) {
    %c0_i32 = arith.constant 0 : i32
    %c0_i32_0 = arith.constant 0 : i32
    %c0_i32_1 = arith.constant 0 : i32
    %c0_i32_2 = arith.constant 0 : i32
    return %arg0, %c0_i32, %c0_i32_0, %c0_i32_1 : i32, i32, i32, i32
  }
  func.func @transform_3(%arg0: i32) -> (i32, i32, i32) {
    %c0_i32 = arith.constant 0 : i32
    %c0_i32_0 = arith.constant 0 : i32
    %c0_i32_1 = arith.constant 0 : i32
    return %arg0, %c0_i32, %c0_i32_0 : i32, i32, i32
  }
}

</mosaic_0001>

<bundles_post_ra>
// kernel: tpu_custom_call.1
= control target key start
LH: loop header
LB: loop body
LE: loop exit
PB: predicated region body
PF: predicated region fallthrough
CT: control target
= control target key end

     0   :  { %9 = vsyncpa [#allocation3], 0  ;;  %s5919_s0 = inlined_call_operand.hbm [shape: f32[2,16,16,128], index: 0, kind: input, shape index: {}]   ;;  %s5920_s1 = inlined_call_operand.hbm [shape: bf16[3,3,128,128], index: 1, kind: input, shape index: {}]   ;;  %s5921_s2 = inlined_call_operand.hbm [shape: bf16[2,16,16,128], index: 2, kind: output, shape index: {0}]   ;;  %s5922_s3 = inlined_call_operand.hbm [shape: f32[2,2,128], index: 3, kind: output, shape index: {1}]  }
   0x1   :  { %11 = vsyncpa [#allocation3 + $0x1], 0 }
   0x2   :  { %12 = vsyncpa [#allocation6], 0 }
   0x3   :  { %13 = vsyncpa [#allocation4], 0 }
   0x4   :  { %15 = vsyncpa [#allocation4 + $0x1], 0 }
   0x5   :  { %16 = vsyncpa [#allocation9], 0 }
   0x6   :  { %18 = vsyncpa [#allocation9 + $0x1], 0  ;;  %s4677_s12 = smov 0   ;;  %s4679_s13 = smov 0  }
   0x7   :  { %s4681_s14 = smov 0   ;;  %s4683_s15 = smov 0  }
   0x8 LB: > { %s4698_s16 = sadd.s32 4294967295, %s4644_s15   ;;  %s3435_s17 = sadd.s32 4294967294, %s4644_s15   ;;  %s4644_s15 = sphi %s4683_s15, %s6002_s15   ;;  %s4640_s14 = sphi %s4681_s14, %s6001_s14   ;;  %s4636_s13 = sphi %s4679_s13, %s6000_s13   ;;  %s4632_s12 = sphi %s4677_s12, %s5999_s12  }
   0x9   : > { %p44_p0 = scmp.ne.s32.totalorder %s4636_s13, %s4632_s12  ;;  %p5923_p1 = scmp.eq.s32.totalorder %s4698_s16, 0 }
   0xa   : > { %p95_p3 = scmp.eq.s32.totalorder %s3435_s17, 1  ;;  %p3436_p5 = scmp.ge.s32.totalorder %s4644_s15, 1 }
   0xb   : > { %p4707_p4 = por %p5923_p1, %p44_p0  ;;  %p128_p7 = scmp.lt.s32.totalorder %s4644_s15, 3 }
   0xc   : > { %p4712_p6 = por %p95_p3, %p44_p0  ;;  %s4646_s21 = smov [#allocation5]  }
   0xd   : > { %s5927_s18 = scalar_select %p4707_p4, 1, 0 }
   0xe   : > { %s5928_s19 = scalar_select %p4712_p6, 1, 0 }
   0xf   : > { %p4717_p8 = pnand %p3436_p5, %p128_p7  ;;  %s140_s22 = sshll.u32 %s4646_s21, 4  ;;  %s141_s22 = int_to_ptr.vmem [resolvable:$true] %s140_s22 }
  0x10   : > { %s4731_s24 = sadd.s32 1, %s4644_s15   ;;  %s31_s25 = sadd.s32 1, %s4640_s14 }
  0x11   : > { %s5929_s20 = scalar_select %p4717_p8, 1, 0 }
  0x12   : > { %p4361_p9 = pneg %p4717_p8  ;;  %s28_s26 = ssub.s32 %s4644_s15, %s4731_s24 }
  0x13   : > { %s4503_s27 = scalar_lea.vmem %s141_s22, 9216  ;;  %p4511_p5 = scmp.lt.s32.totalorder %s141_s22, %s141_s22 }
  0x14   : > { %p4726_p11 = pnand %p4361_p9, %p5923_p1  ;;  %p4504_p13 = scmp.ne.s32.totalorder %s141_s22, %s4503_s27 }
  0x15   : > { %p4512_p7 = scmp.lt.s32.totalorder %s4503_s27, %s4503_s27 }
  0x16   : > { %p4494_p12 = pneg %p4726_p11 }
  0x17   : > { %p4513_p10 = por %p4512_p7, %p4511_p5 }
  0x18   : > { %p4506_p0 = pnand %p4504_p13, %p4494_p12 }
  0x1a   : > { %p4507_p3 = pneg %p4506_p0 }
  0x1c   : > { %p4514_p2 = pnand %p4513_p10, %p4507_p3 }
  0x1e   : > { %4517 = shalt.err (!%p4514_p2)
}
  0x1f   : > { %s4647_s28 = smov 64   ;;  %s4648_s29 = smov 4  }
  0x20   : > { %4364 = dma.hbm_to_vmem [thread:$0]  (!%p4726_p11), %s5920_s1, 9216, %s141_s22, [#allocation6], %s4647_s28, %s4647_s28, %s4648_s29  }
  0x21   : > { %p29_p9 = scmp.eq.s32.totalorder %s28_s26, 0  ;;  %p38_p12 = scmp.ne.s32.totalorder %s4640_s14, %s4636_s13 }
  0x22   : > { %p39_p10 = scmp.eq.s32.totalorder %s4644_s15, 0  ;;  %p4377_p2 = scmp.lt.s32.totalorder %s4644_s15, 2 }
  0x23   : > { %s4748_s5 = scalar_select %p29_p9, %s4640_s14, %s31_s25  }
  0x24   : > { %p40_p13 = por %p39_p10, %p38_p12  ;;  %p5931_p0 = scmp.eq.s32.totalorder %s4698_s16, 1 }
  0x25   : > { %s154_s7 = sand.u32 1, %s4640_s14   ;;  %s3558_s8 = sshll.u32 %s4644_s15, 12 }
  0x26   : > { %p4752_p3 = por %p5931_p0, %p38_p12  ;;  %s3439_s9 = sshll.u32 %s154_s7, 8 }
  0x27   : > { %s4761_s17 = scalar_lea.hbm %s5919_s0, %s3558_s8  ;;  %s158_s21 = scalar_lea.vmem [#allocation2], %s3439_s9 }
  0x28   : > { %s5932_s6 = scalar_select %p4752_p3, 1, 0 }
  0x29   : > { %s165_s22 = sshll.u32 %s158_s21, 4  ;;  %p4763_p11 = pnand %p4377_p2, %p40_p13  ;;  %s4767_s22 = int_to_ptr.vmem [resolvable:$true] %s165_s22 }
  0x2a   : > { %s4769_s25 = scalar_lea.sflag [#allocation3], %s154_s7  ;;  %s4518_s26 = scalar_lea.hbm %s4761_s17, 4096 }
  0x2b   : > { %p4519_p5 = scmp.ne.s32.totalorder %s4761_s17, %s4518_s26  ;;  %p4520_p7 = pneg %p4763_p11 }
  0x2c   : > { %s4523_s29 = scalar_lea.hbm %s5919_s0, 8192  ;;  %p4524_p10 = scmp.lt.s32.totalorder %s4761_s17, %s5919_s0 }
  0x2d   : > { %p4521_p9 = pnand %p4520_p7, %p4519_p5  ;;  %p4525_p2 = scmp.lt.s32.totalorder %s4523_s29, %s4518_s26 }
  0x2f   : > { %p4522_p12 = pneg %p4521_p9  ;;  %p4526_p13 = por %p4525_p2, %p4524_p10 }
  0x31   : > { %p4527_p0 = pnand %p4526_p13, %p4522_p12 }
  0x33   : > { %4530 = shalt.err (!%p4527_p0)
}
  0x34   : > { %s4531_s7 = scalar_lea.vmem %s4767_s22, 4096  ;;  %s4649_s8 = smov [#allocation2]  }
  0x35   : > { %p4532_p1 = scmp.ne.s32.totalorder %s4767_s22, %s4531_s7  ;;  %s4536_s9 = sshll.u32 %s4649_s8, 4  ;;  %s4537_s9 = int_to_ptr.vmem [resolvable:$false] %s4536_s9 }
  0x36   : > { %s4538_s10 = scalar_lea.vmem %s4537_s9, 8192  ;;  %p4539_p9 = scmp.lt.s32.totalorder %s4767_s22, %s4537_s9 }
  0x37   : > { %p4534_p6 = pnand %p4532_p1, %p4520_p7  ;;  %p4540_p3 = scmp.lt.s32.totalorder %s4538_s10, %s4531_s7 }
  0x39   : > { %p4535_p5 = pneg %p4534_p6  ;;  %p4541_p4 = por %p4540_p3, %p4539_p9 }
  0x3b   : > { %p4542_p8 = pnand %p4541_p4, %p4535_p5 }
  0x3d   : > { %4545 = shalt.err (!%p4542_p8)
}
  0x3e   : > { %s4650_s11 = smov 128   ;;  %s4651_s21 = smov 8  }
  0x3f   : > { %4368 = dma.hbm_to_vmem [thread:$0]  (!%p4763_p11), %s4761_s17, 4096, %s4767_s22, %s4769_s25, %s4650_s11, %s4650_s11, %s4651_s21  }
  0x40   : > { %p5934_p1 = scmp.ne.s32.totalorder %s5929_s20, 0 }
  0x42   : > { %177 = sbr.rel (%p5934_p1) target bundleno = 639 (0x27f), region = 28 }
  0x47   : > { %s4793_s26 = sand.u32 1, %s4636_s13   ;;  %p5935_p4 = scmp.ne.s32.totalorder %s5927_s18, 0 }
  0x48   : > { %s3443_s27 = sshll.u32 %s4793_s26, 8  ;;  %s180_s28 = scalar_lea.sflag [#allocation3], %s4793_s26 }
  0x49   : > { %s4797_s29 = scalar_lea.vmem [#allocation2], %s3443_s27 }
  0x4a   : > { %4615 = dma.done.wait (%p5935_p4), %s180_s28, 4096  }
  0x4b   : > { %4617 = vsyncadd (%p5935_p4), %s180_s28, 4294963200  ;;  %p5936_p6 = scmp.eq.s32.totalorder %s4698_s16, 0 }
  0x4d   : > { %4619 = dma.done.wait (%p5936_p6), [#allocation6], 9216   ;;  %p5937_p8 = pmov %p5936_p6 }
  0x4e   : > { %v4420_v0 = vld [vmem:[#allocation5 + $0xf8] sm:$0xff]   ;;  %v4421_v1 = vld [vmem:[#allocation5 + $0xf0] sm:$0xff]   ;;  %v4422_v2 = vld [vmem:[#allocation5 + $0xe8] sm:$0xff]   ;;  %vm408_vm0 = vcmask 1040384   ;;  %vm409_vm1 = vsmask.f32 256 }
  0x4f   : > { %4621 = vsyncadd (%p5937_p8), [#allocation6], 4294958080  ;;  %3903 = vmatprep.subr.bf16.mxu0 %v4420_v0  ;;  %4335 = vmatprep.subr.bf16.mxu1 %v4420_v0  ;;  %v4423_v3 = vld [vmem:[#allocation5 + $0xe0] sm:$0xff]   ;;  %v217_v5 = vld [vmem:[%s4797_s29 + $0x8] sm:$0xff]  ;;  %vm1152_vm3 = vsmask.f32 7424 }
  0x50   : > { %3904 = vmatpush3.bf16.msra.mxu0 %v4420_v0  ;;  %4343 = vmatpush3.bf16.msra.mxu1 %v4420_v0  ;;  %v216_v4 = vld [vmem:[%s4797_s29] sm:$0xff]  ;;  %v233_v8 = vld [vmem:[%s4797_s29 + $0x88] sm:$0xff]  ;;  %v218_v10 = vld [vmem:[%s4797_s29 + $0x10] sm:$0xff]  ;;  %vm2175_vm4 = vcmask 1046528   ;;  %s3445_s18 = sshll.u32 %s4793_s26, 7  ;;  %s3591_s17 = sshll.u32 %s4698_s16, 11 }
  0x51   : > { %3905 = vmatprep.subr.bf16.mxu0 %v4421_v1  ;;  %4336 = vmatprep.subr.bf16.mxu1 %v4421_v1  ;;  %v232_v6 = vld [vmem:[%s4797_s29 + $0x80] sm:$0xff]  ;;  %v248_v7 = vpack.c.bf16 %v217_v5, %v216_v4  ;;  %v219_v11 = vld [vmem:[%s4797_s29 + $0x18] sm:$0xff]  ;;  %v234_v14 = vld [vmem:[%s4797_s29 + $0x90] sm:$0xff]  ;;  %s5765_s20 = scalar_lea.vmem [#allocation7], %s3445_s18  ;;  %s5847_s30 = scalar_lea.hbm %s5921_s2, %s3591_s17 }
  0x52   : > { %v256_v9 = vpack.c.bf16 %v233_v8, %v232_v6  ;;  %v235_v15 = vld [vmem:[%s4797_s29 + $0x98] sm:$0xff]  ;;  %v249_v20 = vpack.c.bf16 %v219_v11, %v218_v10  ;;  %vm4819_vm2 = vmand %vm408_vm0, %vm409_vm1  ;;  %v4425_v24 = vld [vmem:[#allocation5 + $0xd0] sm:$0xff]   ;;  %s3307_s22 = sshll.u32 %s5765_s20, 4  ;;  %s3289_s4 = scalar_lea.sflag [#allocation4], %s4793_s26  ;;  %s5849_s22 = int_to_ptr.vmem [resolvable:$true] %s3307_s22 }
  0x53   : > { %v265_v12 = vshrl.u32 %v248_v7, 16  ;;  %v268_v13 = vshll.u32 %v248_v7, 16  ;;  %v4424_v16 = vld [vmem:[#allocation5 + $0xd8] sm:$0xff]   ;;  %v257_v23 = vpack.c.bf16 %v235_v15, %v234_v14  ;;  %v220_v27 = vld [vmem:[%s4797_s29 + $0x20] sm:$0xff]  ;;  %v221_v28 = vld [vmem:[%s4797_s29 + $0x28] sm:$0xff]  ;;  %s4546_s7 = scalar_lea.vmem %s5849_s22, 2048 }
  0x54   : > { %3906 = vmatpush3.bf16.msra.mxu0 %v4421_v1  ;;  %4344 = vmatpush3.bf16.msra.mxu1 %v4421_v1  ;;  %v321_v17 = vshrl.u32 %v256_v9, 16  ;;  %v324_v18 = vshll.u32 %v256_v9, 16  ;;  %v236_v29 = vld [vmem:[%s4797_s29 + $0xa0] sm:$0xff]  ;;  %v272_v31 = vshrl.u32 %v249_v20, 16  ;;  %v250_v32 = vpack.c.bf16 %v221_v28, %v220_v27  ;;  %v237_v33 = vld [vmem:[%s4797_s29 + $0xa8] sm:$0xff]  ;;  %v222_v34 = vld [vmem:[%s4797_s29 + $0x30] sm:$0xff]  ;;  %p4547_p3 = scmp.ne.s32.totalorder %s5849_s22, %s4546_s7 }
  0x55   : > { %3907 = vmatprep.subr.bf16.mxu0 %v4422_v2  ;;  %4337 = vmatprep.subr.bf16.mxu1 %v4422_v2  ;;  %v4815_v19 = vrot.slane %v265_v12, 7  ;;  %v223_v35 = vld [vmem:[%s4797_s29 + $0x38] sm:$0xff]  ;;  %v328_v37 = vshrl.u32 %v257_v23, 16  ;;  %v258_v38 = vpack.c.bf16 %v237_v33, %v236_v29  ;;  %v238_v39 = vld [vmem:[%s4797_s29 + $0xb0] sm:$0xff]  ;;  %v4426_v43 = vld [vmem:[#allocation5 + $0xc8] sm:$0xff]   ;;  %v275_v47 = vshll.u32 %v249_v20, 16 }
  0x56   : > { %v4823_v22 = vrot.slane %v321_v17, 7  ;;  %v239_v40 = vld [vmem:[%s4797_s29 + $0xb8] sm:$0xff]  ;;  %v279_v41 = vshrl.u32 %v250_v32, 16  ;;  %v4844_v42 = vpack.c.bf16 %v223_v35, %v222_v34  ;;  %v4849_v46 = vrot.slane %v272_v31, 7  ;;  %v4427_v53 = vld [vmem:[#allocation5 + $0xc0] sm:$0xff]   ;;  %v225_v58 = vld [vmem:[%s4797_s29 + $0x48] sm:$0xff] }
  0x57   : > { %v270_v25 = vor.u32 %v268_v13, %v4815_v19  ;;  %v335_v44 = vshrl.u32 %v258_v38, 16  ;;  %v4846_v45 = vpack.c.bf16 %v239_v40, %v238_v39  ;;  %v331_v48 = vshll.u32 %v257_v23, 16  ;;  %v224_v57 = vld [vmem:[%s4797_s29 + $0x40] sm:$0xff]  ;;  %v241_v62 = vld [vmem:[%s4797_s29 + $0xc8] sm:$0xff]  ;;  %v226_v63 = vld [vmem:[%s4797_s29 + $0x50] sm:$0xff]  ;;  %p5996_p11 = scmp.ne.s32.totalorder %s5932_s6, 0 }
  0x58   : > { %3908 = vmatpush3.bf16.msra.mxu0 %v4422_v2  ;;  %4345 = vmatpush3.bf16.msra.mxu1 %v4422_v2  ;;  %v326_v26 = vor.u32 %v324_v18, %v4823_v22  ;;  %v4851_v49 = vrot.slane %v328_v37, 7  ;;  %v282_v50 = vshll.u32 %v250_v32, 16  ;;  %v4853_v51 = vrot.slane %v279_v41, 7  ;;  %v240_v61 = vld [vmem:[%s4797_s29 + $0xc0] sm:$0xff]  ;;  %v227_v4 = vld [vmem:[%s4797_s29 + $0x58] sm:$0xff]  ;;  %v242_v5 = vld [vmem:[%s4797_s29 + $0xd0] sm:$0xff] }
  0x59   : > { %3909 = vmatprep.subr.bf16.mxu0 %v4423_v3  ;;  %4338 = vmatprep.subr.bf16.mxu1 %v4423_v3  ;;  %v4832_v30 = vsel %vm4819_vm2, 0, %v270_v25  ;;  %v286_v52 = vshrl.u32 %v4844_v42, 16  ;;  %v4856_v54 = vrot.slane %v335_v44, 7  ;;  %v338_v55 = vshll.u32 %v258_v38, 16  ;;  %v243_v6 = vld [vmem:[%s4797_s29 + $0xd8] sm:$0xff]  ;;  %v4430_v20 = vld [vmem:[#allocation5 + $0x30] sm:$0xff]   ;;  %p4548_p7 = pnand %p4547_p3, %p5996_p11 }
  0x5a   : > { %3919 = vmatprep.mubr.bf16.mxu0 %v4832_v30  ;;  %v4840_v36 = vsel %vm4819_vm2, 0, %v326_v26  ;;  %v342_v56 = vshrl.u32 %v4846_v45, 16  ;;  %v277_v59 = vor.u32 %v275_v47, %v4849_v46  ;;  %v252_v60 = vpack.c.bf16 %v225_v58, %v224_v57  ;;  %v4428_v7 = vld [vmem:[#allocation5 + $0x38] sm:$0xff]   ;;  %v4431_v23 = vld [vmem:[#allocation5 + $0x1b0] sm:$0xff]   ;;  %v228_v35 = vld [vmem:[%s4797_s29 + $0x60] sm:$0xff]  ;;  %s4653_s8 = smov [#allocation7]  }
  0x5b   : > { %3935 = vmatprep.mubr.bf16.mxu1 %v4840_v36  ;;  %v333_v0 = vor.u32 %v331_v48, %v4851_v49  ;;  %v289_v1 = vshll.u32 %v4844_v42, 16  ;;  %v345_v2 = vshll.u32 %v4846_v45, 16  ;;  %v4429_v8 = vld [vmem:[#allocation5 + $0x1b8] sm:$0xff]   ;;  %v284_v9 = vor.u32 %v282_v50, %v4853_v51  ;;  %v229_v37 = vld [vmem:[%s4797_s29 + $0x68] sm:$0xff]  ;;  %v244_v42 = vld [vmem:[%s4797_s29 + $0xe0] sm:$0xff]  ;;  %p4549_p12 = pneg %p4548_p7  ;;  %s4550_s9 = sshll.u32 %s4653_s8, 4  ;;  %s4551_s9 = int_to_ptr.vmem [resolvable:$false] %s4550_s9 }
  0x5c   : > { %3910 = vmatpush3.bf16.msra.mxu0 %v4423_v3  ;;  %4346 = vmatpush3.bf16.msra.mxu1 %v4423_v3  ;;  %v260_v3 = vpack.c.bf16 %v241_v62, %v240_v61  ;;  %v4872_v10 = vrot.slane %v286_v52, 7  ;;  %v293_v11 = vshrl.u32 %v252_v60, 16  ;;  %v253_v12 = vpack.c.bf16 %v227_v4, %v226_v63  ;;  %v230_v44 = vld [vmem:[%s4797_s29 + $0x70] sm:$0xff]  ;;  %v231_v52 = vld [vmem:[%s4797_s29 + $0x78] sm:$0xff]  ;;  %s4552_s10 = scalar_lea.vmem %s4551_s9, 4096  ;;  %p4553_p10 = scmp.lt.s32.totalorder %s5849_s22, %s4551_s9 }
  0x5d   : > { %3911 = vmatprep.subr.bf16.mxu0 %v4424_v16  ;;  %4339 = vmatprep.subr.bf16.mxu1 %v4424_v16  ;;  %v340_v13 = vor.u32 %v338_v55, %v4856_v54  ;;  %v4875_v14 = vrot.slane %v342_v56, 7  ;;  %v296_v18 = vshll.u32 %v252_v60, 16  ;;  %v4883_v28 = vsel %vm4819_vm2, 0, %v277_v59  ;;  %v4433_v55 = vld [vmem:[#allocation5 + $0x1a8] sm:$0xff]   ;;  %v246_v58 = vld [vmem:[%s4797_s29 + $0xf0] sm:$0xff]  ;;  %v247_v59 = vld [vmem:[%s4797_s29 + $0xf8] sm:$0xff]  ;;  %p4554_p2 = scmp.lt.s32.totalorder %s4552_s10, %s4546_s7 }
  0x5e   : > { %v349_v15 = vshrl.u32 %v260_v3, 16  ;;  %v4877_v17 = vrot.slane %v293_v11, 7  ;;  %v352_v25 = vshll.u32 %v260_v3, 16  ;;  %v300_v26 = vshrl.u32 %v253_v12, 16 }
  0x5f   : > { %v4887_v29 = vsel %vm4819_vm2, 0, %v333_v0  ;;  %v4891_v31 = vsel %vm4819_vm2, 0, %v284_v9  ;;  %v4895_v32 = vsel %vm4819_vm2, 0, %v340_v13  ;;  %v291_v33 = vor.u32 %v289_v1, %v4872_v10  ;;  %v4434_v1 = vld [vmem:[#allocation5 + $0x20] sm:$0xff]   ;;  %p4555_p13 = por %p4554_p2, %p4553_p10 }
  0x60   : > { %3912 = vmatpush3.bf16.msra.mxu0 %v4424_v16  ;;  %4347 = vmatpush3.bf16.msra.mxu1 %v4424_v16  ;;  %v261_v16 = vpack.c.bf16 %v243_v6, %v242_v5  ;;  %v347_v34 = vor.u32 %v345_v2, %v4875_v14  ;;  %v298_v38 = vor.u32 %v296_v18, %v4877_v17  ;;  %v303_v39 = vshll.u32 %v253_v12, 16  ;;  %v4435_v2 = vld [vmem:[#allocation5 + $0x1a0] sm:$0xff]   ;;  %v4436_v18 = vld [vmem:[#allocation5 + $0x18] sm:$0xff]  }
  0x61   : > { %3913 = vmatprep.subr.bf16.mxu0 %v4425_v24  ;;  %4340 = vmatprep.subr.bf16.mxu1 %v4425_v24  ;;  %v4902_v41 = vpack.c.bf16 %v229_v37, %v228_v35  ;;  %v4910_v47 = vrot.slane %v300_v26, 7  ;;  %v4917_v56 = vsel %vm4819_vm2, 0, %v291_v33  ;;  %v255_v57 = vpack.c.bf16 %v231_v52, %v230_v44  ;;  %v4438_v35 = vld [vmem:[#allocation5 + $0x10] sm:$0xff]   ;;  %p4556_p0 = pnand %p4555_p13, %p4549_p12 }
  0x62   : > { %v356_v27 = vshrl.u32 %v261_v16, 16  ;;  %v359_v40 = vshll.u32 %v261_v16, 16  ;;  %v4924_v60 = vsel %vm4819_vm2, %v4849_v46, 0  ;;  %v4930_v61 = vsel %vm4819_vm2, 0, %v347_v34 }
  0x63   : > { %v4934_v62 = vsel %vm4819_vm2, 0, %v298_v38  ;;  %v307_v63 = vshrl.u32 %v4902_v41, 16  ;;  %v305_v3 = vor.u32 %v303_v39, %v4910_v47  ;;  %v1174_v5 = vshrl.u32 %v4883_v28, 16  ;;  %v4439_v39 = vld [vmem:[#allocation5 + $0x190] sm:$0xff]  }
  0x64   : > { %3914 = vmatpush3.bf16.msra.mxu0 %v4425_v24  ;;  %4348 = vmatpush3.bf16.msra.mxu1 %v4425_v24  ;;  %v4879_v24 = vrot.slane %v349_v15, 7  ;;  %v4912_v48 = vrot.slane %v356_v27, 7  ;;  %v310_v6 = vshll.u32 %v4902_v41, 16  ;;  %v314_v11 = vshrl.u32 %v255_v57, 16 }
  0x65   : > { %3915 = vmatprep.subr.bf16.mxu0 %v4426_v43  ;;  %4341 = vmatprep.subr.bf16.mxu1 %v4426_v43  ;;  %v4946_v12 = vrot.slane %v307_v63, 7  ;;  %v4954_v15 = vsel %vm4819_vm2, 0, %v305_v3  ;;  %v4983_v52 = vsel %vm4819_vm2, %v4853_v51, 0 }
  0x66   : > { %v354_v45 = vor.u32 %v352_v25, %v4879_v24  ;;  %v361_v4 = vor.u32 %v359_v40, %v4912_v48  ;;  %v4960_v26 = vrot.slane %v314_v11, 7  ;;  %v1181_v40 = vshll.u32 %v4924_v60, 16 }
  0x67   : > { %v312_v33 = vor.u32 %v310_v6, %v4946_v12  ;;  %v1193_v51 = vshll.u32 %v4983_v52, 16  ;;  %v5005_v6 = vsel %vm4819_vm2, %v4872_v10, 0  ;;  %v4445_v10 = vld [vmem:[#allocation5 + $0x138] sm:$0xff]  }
  0x68   : > { %3916 = vmatpush3.bf16.msra.mxu0 %v4426_v43  ;;  %4349 = vmatpush3.bf16.msra.mxu1 %v4426_v43  ;;  %v245_v43 = vld [vmem:[%s4797_s29 + $0xe8] sm:$0xff]  ;;  %v4939_v46 = vsel %vm4819_vm2, 0, %v354_v45  ;;  %v4958_v16 = vsel %vm4819_vm2, 0, %v361_v4  ;;  %v4443_v4 = vld [vmem:[#allocation5 + $0x180] sm:$0xff]   ;;  %v1205_v11 = vshll.u32 %v5005_v6, 16 }
  0x69   : > { %3917 = vmatprep.subr.bf16.mxu0 %v4427_v53  ;;  %4342 = vmatprep.subr.bf16.mxu1 %v4427_v53  ;;  %v262_v50 = vpack.c.bf16 %v245_v43, %v244_v42  ;;  %v4971_v41 = vsel %vm4819_vm2, 0, %v312_v33  ;;  %v4440_v45 = vld [vmem:[#allocation5 + $0x8] sm:$0xff]   ;;  %v1195_v3 = vrot.slane %v1193_v51, 1  ;;  %v4652_v33 = vmov 0   ;;  %v4447_v51 = vld [vmem:[#allocation5 + $0x130] sm:$0xff]  }
  0x6b   : > { %v363_v0 = vshrl.u32 %v262_v50, 16  ;;  %v366_v9 = vshll.u32 %v262_v50, 16  ;;  %v1183_v50 = vrot.slane %v1181_v40, 1  ;;  %v1224_v40 = vshll.u32 %v4954_v15, 16 }
  0x6c   : > { %3918 = vmatpush3.bf16.msra.mxu0 %v4427_v53  ;;  %4350 = vmatpush3.bf16.msra.mxu1 %v4427_v53  ;;  %v4432_v53 = vld [vmem:[#allocation5 + $0x28] sm:$0xff]  }
  0x6d   : > { %3951 = vmatprep.subr.bf16.mxu1 %v4428_v7  ;;  %3999 = vmatprep.subr.bf16.mxu0 %v4429_v8  ;;  %v4948_v13 = vrot.slane %v363_v0, 7  ;;  %v4442_v0 = vld [vmem:[#allocation5] sm:$0xff]  }
  0x6f   : > { %3920 = vmatmul.mubr.bf16.vlgmr.msra.gmra.mxu0 %v4883_v28  ;;  %3936 = vmatmul.mubr.bf16.vlgmr.msra.gmra.mxu1 %v4887_v29  ;;  %v368_v34 = vor.u32 %v366_v9, %v4948_v13  ;;  %v1200_v9 = vshll.u32 %v4917_v56, 16 }
  0x70   : > { %3952 = vmatpush3.bf16.msra.mxu1 %v4428_v7  ;;  %4000 = vmatpush3.bf16.msra.mxu0 %v4429_v8  ;;  %v263_v7 = vpack.c.bf16 %v247_v59, %v246_v58  ;;  %v1176_v8 = vshll.u32 %v4883_v28, 16  ;;  %v1186_v58 = vshrl.u32 %v4891_v31, 16  ;;  %v1188_v59 = vshll.u32 %v4891_v31, 16 }
  0x71   : > { %3953 = vmatprep.subr.bf16.mxu1 %v4430_v20  ;;  %4001 = vmatprep.subr.bf16.mxu0 %v4431_v23  ;;  %v4975_v42 = vsel %vm4819_vm2, 0, %v368_v34  ;;  %v1212_v34 = vshll.u32 %v4934_v62, 16 }
  0x72   : > { %3923 = vmatprep.mubr.bf16.mxu0 %v4891_v31  ;;  %3939 = vmatprep.mubr.bf16.mxu1 %v4895_v32  ;;  %v370_v25 = vshrl.u32 %v263_v7, 16  ;;  %v373_v27 = vshll.u32 %v263_v7, 16  ;;  %v1178_v38 = vrot.slane %v1176_v8, 1  ;;  %v1198_v8 = vshrl.u32 %v4917_v56, 16 }
  0x74   : > { %3954 = vmatpush3.bf16.msra.mxu1 %v4430_v20  ;;  %4002 = vmatpush3.bf16.msra.mxu0 %v4431_v23  ;;  %v4437_v20 = vld [vmem:[#allocation5 + $0x198] sm:$0xff]   ;;  %v317_v23 = vshll.u32 %v255_v57, 16  ;;  %v4966_v37 = vrot.slane %v370_v25, 7  ;;  %v1179_v43 = vor.u32 %v1178_v38, %v1174_v5  ;;  %v5018_v25 = vsel %vm4819_vm2, %v4877_v17, 0 }
  0x75   : > { %3955 = vmatprep.subr.bf16.mxu1 %v4432_v53  ;;  %4003 = vmatprep.subr.bf16.mxu0 %v4433_v55  ;;  %v5028_v38 = vsel %vm4819_vm2, %v4910_v47, 0  ;;  %v4446_v47 = vld [vmem:[#allocation5 + $0x70] sm:$0xff]  }
  0x76   : > { %v319_v44 = vor.u32 %v317_v23, %v4960_v26  ;;  %v4987_v57 = vsel %vm1152_vm3, %v1179_v43, %v1183_v50  ;;  %v1207_v23 = vrot.slane %v1205_v11, 1  ;;  %v1229_v43 = vshll.u32 %v5028_v38, 16 }
  0x77   : > { %3924 = vmatmul.mubr.bf16.gmra.mxu0 %v4917_v56  ;;  %3940 = vmatmul.mubr.bf16.gmra.mxu1 %v4930_v61  ;;  %v5036_v50 = vsel %vm4819_vm2, %v4946_v12, 0  ;;  %v5047_v12 = vsel %vm4819_vm2, %v4960_v26, 0  ;;  %v4448_v26 = vld [vmem:[#allocation5 + $0x68] sm:$0xff]  }
  0x78   : > { %3956 = vmatpush3.bf16.msra.mxu1 %v4432_v53  ;;  %4004 = vmatpush3.bf16.msra.mxu0 %v4433_v55  ;;  %v375_v53 = vor.u32 %v373_v27, %v4966_v37  ;;  %v4441_v55 = vld [vmem:[#allocation5 + $0x188] sm:$0xff]   ;;  %v4996_v63 = vsel %vm4819_vm2, 0, %v319_v44  ;;  %v1210_v27 = vshrl.u32 %v4934_v62, 16  ;;  %v1214_v44 = vrot.slane %v1212_v34, 1 }
  0x79   : > { %3957 = vmatprep.subr.bf16.mxu1 %v4434_v1  ;;  %4005 = vmatprep.subr.bf16.mxu0 %v4435_v2 }
  0x7a   : > { %3927 = vmatprep.mubr.bf16.mxu0 %v4934_v62  ;;  %3943 = vmatprep.mubr.bf16.mxu1 %v4939_v46 }
  0x7c   : > { %3958 = vmatpush3.bf16.msra.mxu1 %v4434_v1  ;;  %4006 = vmatpush3.bf16.msra.mxu0 %v4435_v2  ;;  %v1190_v1 = vrot.slane %v1188_v59, 1  ;;  %v5000_v2 = vsel %vm4819_vm2, 0, %v375_v53  ;;  %v1234_v59 = vshrl.u32 %v4971_v41, 16 }
  0x7d   : > { %3959 = vmatprep.subr.bf16.mxu1 %v4436_v18  ;;  %4007 = vmatprep.subr.bf16.mxu0 %v4437_v20 }
  0x7e   : > { %v1191_v5 = vor.u32 %v1190_v1, %v1186_v58  ;;  %v1231_v58 = vrot.slane %v1229_v43, 1  ;;  %v1236_v1 = vshll.u32 %v4971_v41, 16  ;;  %v4450_v43 = vld [vmem:[#allocation5 + $0x60] sm:$0xff]  }
  0x7f   : > { %3928 = vmatmul.mubr.bf16.gmra.mxu0 %v4954_v15  ;;  %3944 = vmatmul.mubr.bf16.gmra.mxu1 %v4958_v16 }
  0x80   : > { %3960 = vmatpush3.bf16.msra.mxu1 %v4436_v18  ;;  %4008 = vmatpush3.bf16.msra.mxu0 %v4437_v20  ;;  %v5010_v7 = vsel %vm1152_vm3, %v1191_v5, %v1195_v3  ;;  %v4444_v18 = vld [vmem:[#allocation5 + $0x78] sm:$0xff]   ;;  %v1202_v20 = vrot.slane %v1200_v9, 1  ;;  %v1241_v3 = vshll.u32 %v5036_v50, 16  ;;  %v1246_v5 = vshrl.u32 %v4996_v63, 16 }
  0x81   : > { %3961 = vmatprep.subr.bf16.mxu1 %v4438_v35  ;;  %4009 = vmatprep.subr.bf16.mxu0 %v4439_v39  ;;  %v1253_v9 = vshll.u32 %v5047_v12, 16 }
  0x82   : > { %3931 = vmatprep.mubr.bf16.mxu0 %v4971_v41  ;;  %3947 = vmatprep.mubr.bf16.mxu1 %v4975_v42  ;;  %v1203_v17 = vor.u32 %v1202_v20, %v1198_v8  ;;  %v1248_v8 = vshll.u32 %v4996_v63, 16  ;;  %v1238_v20 = vrot.slane %v1236_v1, 1  ;;  %v2182_v1 = vrot.slane %v4924_v60, 1 }
  0x83   : > { %v2190_v60 = vrot.slane %v4934_v62, 1 }
  0x84   : > { %3962 = vmatpush3.bf16.msra.mxu1 %v4438_v35  ;;  %4010 = vmatpush3.bf16.msra.mxu0 %v4439_v39  ;;  %v1217_v35 = vshll.u32 %v5018_v25, 16  ;;  %v1222_v39 = vshrl.u32 %v4954_v15, 16  ;;  %v5039_v53 = vsel %vm1152_vm3, %v1203_v17, %v1207_v23  ;;  %v1243_v23 = vrot.slane %v1241_v3, 1  ;;  %v4458_v3 = vld [vmem:[#allocation5 + $0x40] sm:$0xff]  }
  0x85   : > { %3963 = vmatprep.subr.bf16.mxu1 %v4440_v45  ;;  %4011 = vmatprep.subr.bf16.mxu0 %v4441_v55 }
  0x87   : > { %3932 = vmatmul.mubr.bf16.gmra.mxu0 %v4996_v63  ;;  %3948 = vmatmul.mubr.bf16.gmra.mxu1 %v5000_v2 }
  0x88   : > { %3964 = vmatpush3.bf16.msra.mxu1 %v4440_v45  ;;  %4012 = vmatpush3.bf16.msra.mxu0 %v4441_v55  ;;  %v1219_v45 = vrot.slane %v1217_v35, 1  ;;  %v1226_v55 = vrot.slane %v1224_v40, 1  ;;  %v1250_v35 = vrot.slane %v1248_v8, 1  ;;  %v2185_v8 = vrot.slane %v4983_v52, 1 }
  0x89   : > { %3965 = vmatprep.subr.bf16.mxu1 %v4442_v0  ;;  %4013 = vmatprep.subr.bf16.mxu0 %v4443_v4 }
  0x8a   : > { %3967 = vmatprep.mubr.bf16.mxu1 %v4652_v33  ;;  %4015 = vmatprep.mubr.bf16.mxu0 %v4883_v28 }
  0x8c   : > { %3966 = vmatpush3.bf16.msra.mxu1 %v4442_v0  ;;  %4014 = vmatpush3.bf16.msra.mxu0 %v4443_v4  ;;  %v1215_v0 = vor.u32 %v1214_v44, %v1210_v27  ;;  %v1227_v4 = vor.u32 %v1226_v55, %v1222_v39  ;;  %v4449_v27 = vld [vmem:[#allocation5 + $0x128] sm:$0xff]   ;;  %v1255_v39 = vrot.slane %v1253_v9, 1  ;;  %v4451_v44 = vld [vmem:[#allocation5 + $0x120] sm:$0xff]   ;;  %v4454_v55 = vld [vmem:[#allocation5 + $0x50] sm:$0xff]  }
  0x8d   : > { %4047 = vmatprep.subr.bf16.mxu1 %v4444_v18  ;;  %4095 = vmatprep.subr.bf16.mxu0 %v4445_v10 }
  0x8e   : > { %v5055_v11 = vsel %vm1152_vm3, %v1215_v0, %v1219_v45  ;;  %v5060_v34 = vsel %vm1152_vm3, %v1227_v4, %v1231_v58  ;;  %v4452_v45 = vld [vmem:[#allocation5 + $0x58] sm:$0xff]   ;;  %v4455_v58 = vld [vmem:[#allocation5 + $0x110] sm:$0xff]   ;;  %v2181_v0 = vrot.slane %v4883_v28, 1  ;;  %v4459_v4 = vld [vmem:[#allocation5 + $0x100] sm:$0xff]  }
  0x8f   : > { %3968 = vmatmul.mubr.bf16.vlgmr.msra.gmra.mxu1 %v4832_v30  ;;  %4016 = vmatmul.mubr.bf16.vlgmr.msra.gmra.mxu0 %v4891_v31 }
  0x90   : > { %4048 = vmatpush3.bf16.msra.mxu1 %v4444_v18  ;;  %4096 = vmatpush3.bf16.msra.mxu0 %v4445_v10  ;;  %v1239_v18 = vor.u32 %v1238_v20, %v1234_v59  ;;  %v1251_v10 = vor.u32 %v1250_v35, %v1246_v5  ;;  %v4456_v59 = vld [vmem:[#allocation5 + $0x48] sm:$0xff]   ;;  %v2184_v5 = vrot.slane %v4891_v31, 1  ;;  %v5081_v9 = vsel %vm2175_vm4, %v2181_v0, %v2182_v1  ;;  %v4467_v0 = vld [vmem:[#allocation5 + $0xa0] sm:$0xff]  }
  0x91   : > { %3971 = vmatprep.mubr.bf16.mxu1 %v4883_v28  ;;  %4019 = vmatprep.mubr.bf16.mxu0 %v4917_v56  ;;  %v2187_v20 = vrot.slane %v4917_v56, 1  ;;  %v2197_v35 = vrot.slane %v5036_v50, 1  ;;  %v5127_v50 = vsel %vm4819_vm2, %v4815_v19, 0  ;;  %v1260_v1 = vshll.u32 %v4840_v36, 16 }
  0x92   : > { %4049 = vmatprep.subr.bf16.mxu1 %v4446_v47  ;;  %4097 = vmatprep.subr.bf16.mxu0 %v4447_v51  ;;  %v5063_v17 = vsel %vm1152_vm3, %v1239_v18, %v1243_v23  ;;  %v5066_v40 = vsel %vm1152_vm3, %v1251_v10, %v1255_v39  ;;  %v2188_v23 = vrot.slane %v5005_v6, 1  ;;  %v5086_v28 = vsel %vm2175_vm4, %v2184_v5, %v2185_v8  ;;  %v4469_v5 = vld [vmem:[#allocation5 + $0x98] sm:$0xff]  }
  0x93   : > { %v2194_v6 = vrot.slane %v5028_v38, 1  ;;  %v1258_v8 = vshrl.u32 %v4840_v36, 16 }
  0x94   : > { %4050 = vmatpush3.bf16.msra.mxu1 %v4446_v47  ;;  %4098 = vmatpush3.bf16.msra.mxu0 %v4447_v51  ;;  %v4453_v47 = vld [vmem:[#allocation5 + $0x118] sm:$0xff]   ;;  %v4457_v51 = vld [vmem:[#allocation5 + $0x108] sm:$0xff]   ;;  %v5093_v52 = vsel %vm2175_vm4, %v2187_v20, %v2188_v23  ;;  %v1262_v20 = vrot.slane %v1260_v1, 1  ;;  %v5194_v1 = vsel %vm4819_vm2, %v4879_v24, 0  ;;  %v1306_v24 = vshrl.u32 %v4939_v46, 16 }
  0x95   : > { %4051 = vmatprep.subr.bf16.mxu1 %v4448_v26  ;;  %4099 = vmatprep.subr.bf16.mxu0 %v4449_v27 }
  0x97   : > { %3972 = vmatmul.mubr.bf16.gmra.mxu1 %v4891_v31  ;;  %4020 = vmatmul.mubr.bf16.gmra.mxu0 %v4934_v62  ;;  %v2191_v31 = vrot.slane %v5018_v25, 1 }
  0x98   : > { %3975 = vmatprep.mubr.bf16.mxu1 %v4917_v56  ;;  %4023 = vmatprep.mubr.bf16.mxu0 %v4954_v15  ;;  %v2193_v56 = vrot.slane %v4954_v15, 1 }
  0x99   : > { %4052 = vmatpush3.bf16.msra.mxu1 %v4448_v26  ;;  %4100 = vmatpush3.bf16.msra.mxu0 %v4449_v27  ;;  %v2196_v26 = vrot.slane %v4971_v41, 1  ;;  %v4461_v27 = vld [vmem:[#allocation5 + $0xb8] sm:$0xff]   ;;  %v5101_v25 = vsel %vm2175_vm4, %v2190_v60, %v2191_v31  ;;  %v4470_v60 = vld [vmem:[#allocation5 + $0x1d0] sm:$0xff]  }
  0x9a   : > { %4053 = vmatprep.subr.bf16.mxu1 %v4450_v43  ;;  %4101 = vmatprep.subr.bf16.mxu0 %v4451_v44  ;;  %v5105_v39 = vsel %vm2175_vm4, %v2193_v56, %v2194_v6  ;;  %v4471_v31 = vld [vmem:[#allocation5 + $0x90] sm:$0xff]   ;;  %v1263_v56 = vor.u32 %v1262_v20, %v1258_v8 }
  0x9b   : > { %v5110_v38 = vsel %vm2175_vm4, %v2196_v26, %v2197_v35  ;;  %v5165_v26 = vsel %vm4819_vm2, %v4851_v49, 0  ;;  %v4472_v35 = vld [vmem:[#allocation5 + $0x1c8] sm:$0xff]  }
  0x9d   : > { %4054 = vmatpush3.bf16.msra.mxu1 %v4450_v43  ;;  %4102 = vmatpush3.bf16.msra.mxu0 %v4451_v44  ;;  %v1169_v43 = vshll.u32 %v5127_v50, 16 }
  0x9e   : > { %4055 = vmatprep.subr.bf16.mxu1 %v4452_v45  ;;  %4103 = vmatprep.subr.bf16.mxu0 %v4453_v47 }
  0x9f   : > { %3976 = vmatmul.mubr.bf16.gmra.mxu1 %v4934_v62  ;;  %4024 = vmatmul.mubr.bf16.gmra.mxu0 %v4971_v41  ;;  %v4460_v62 = vld [vmem:[#allocation5 + $0x1f8] sm:$0xff]  }
  0xa0   : > { %3979 = vmatprep.mubr.bf16.mxu1 %v4954_v15  ;;  %4027 = vmatprep.mubr.bf16.mxu0 %v4996_v63  ;;  %v2199_v15 = vrot.slane %v4996_v63, 1 }
  0xa1   : > { %4056 = vmatpush3.bf16.msra.mxu1 %v4452_v45  ;;  %4104 = vmatpush3.bf16.msra.mxu0 %v4453_v47  ;;  %v1171_v45 = vrot.slane %v1169_v43, 1  ;;  %v5136_v47 = vrot.slane %v4652_v33, 1 }
  0xa2   : > { %4057 = vmatprep.subr.bf16.mxu1 %v4454_v55  ;;  %4105 = vmatprep.subr.bf16.mxu0 %v4455_v58 }
  0xa5   : > { %4058 = vmatpush3.bf16.msra.mxu1 %v4454_v55  ;;  %4106 = vmatpush3.bf16.msra.mxu0 %v4455_v58  ;;  %v4462_v55 = vld [vmem:[#allocation5 + $0x1f0] sm:$0xff]  }
  0xa6   : > { %4059 = vmatprep.subr.bf16.mxu1 %v4456_v59  ;;  %4107 = vmatprep.subr.bf16.mxu0 %v4457_v51  ;;  %v4463_v58 = vld [vmem:[#allocation5 + $0xb0] sm:$0xff]  }
  0xa7   : > { %3980 = vmatmul.mubr.bf16.gmra.mxu1 %v4971_v41  ;;  %4028 = vmatmul.mubr.bf16.gmra.mxu0 %v4840_v36  ;;  %v2200_v41 = vrot.slane %v5047_v12, 1  ;;  %v1162_v12 = vshrl.u32 %v4832_v30, 16 }
  0xa8   : > { %3983 = vmatprep.mubr.bf16.mxu1 %v4996_v63  ;;  %4031 = vmatprep.mubr.bf16.mxu0 %v4887_v29  ;;  %v1164_v63 = vshll.u32 %v4832_v30, 16 }
  0xa9   : > { %4060 = vmatpush3.bf16.msra.mxu1 %v4456_v59  ;;  %4108 = vmatpush3.bf16.msra.mxu0 %v4457_v51  ;;  %v5113_v18 = vsel %vm2175_vm4, %v2199_v15, %v2200_v41  ;;  %v4464_v59 = vld [vmem:[#allocation5 + $0x1e8] sm:$0xff]   ;;  %v1270_v41 = vshrl.u32 %v4887_v29, 16 }
  0xaa   : > { %4061 = vmatprep.subr.bf16.mxu1 %v4458_v3  ;;  %4109 = vmatprep.subr.bf16.mxu0 %v4459_v4  ;;  %v1166_v10 = vrot.slane %v1164_v63, 1  ;;  %v4465_v51 = vld [vmem:[#allocation5 + $0xa8] sm:$0xff]  }
  0xab   : > { %v4473_v15 = vld [vmem:[#allocation5 + $0x88] sm:$0xff]  }
  0xac   : > { %v1167_v44 = vor.u32 %v1166_v10, %v1162_v12  ;;  %v1277_v12 = vshll.u32 %v5165_v26, 16  ;;  %v1282_v10 = vshrl.u32 %v4895_v32, 16 }
  0xad   : > { %4062 = vmatpush3.bf16.msra.mxu1 %v4458_v3  ;;  %4110 = vmatpush3.bf16.msra.mxu0 %v4459_v4  ;;  %v5153_v3 = vsel %vm4819_vm2, %v4823_v22, 0  ;;  %v4468_v4 = vld [vmem:[#allocation5 + $0x1d8] sm:$0xff]   ;;  %v1272_v22 = vshll.u32 %v4887_v29, 16 }
  0xae   : > { %4143 = vmatprep.subr.bf16.mxu1 %v4460_v62  ;;  %4191 = vmatprep.subr.bf16.mxu0 %v4461_v27  ;;  %v1172_v19 = vsel %vm1152_vm3, %v1167_v44, %v1171_v45  ;;  %v1265_v23 = vshll.u32 %v5153_v3, 16  ;;  %v4475_v45 = vld [vmem:[#allocation5 + $0x80] sm:$0xff]  }
  0xaf   : > { %3984 = vmatmul.mubr.bf16.gmra.mxu1 %v4840_v36  ;;  %4032 = vmatmul.mubr.bf16.gmra.mxu0 %v4895_v32  ;;  %v1274_v63 = vrot.slane %v1272_v22, 1  ;;  %v1313_v22 = vshll.u32 %v5194_v1, 16 }
  0xb0   : > { %3987 = vmatprep.mubr.bf16.mxu1 %v4887_v29  ;;  %4035 = vmatprep.mubr.bf16.mxu0 %v4930_v61  ;;  %v1267_v6 = vrot.slane %v1265_v23, 1 }
  0xb2   : > { %v5176_v49 = vsel %vm1152_vm3, %v1263_v56, %v1267_v6 }
  0xb7   : > { %3988 = vmatmul.mubr.bf16.gmra.mxu1 %v4895_v32  ;;  %4036 = vmatmul.mubr.bf16.gmra.mxu0 %v4939_v46 }
  0xb8   : > { %3991 = vmatprep.mubr.bf16.mxu1 %v4930_v61  ;;  %4039 = vmatprep.mubr.bf16.mxu0 %v4958_v16 }
  0xbf   : > { %3992 = vmatmul.mubr.bf16.gmra.mxu1 %v4939_v46  ;;  %4040 = vmatmul.mubr.bf16.gmra.mxu0 %v4975_v42 }
  0xc0   : > { %3995 = vmatprep.mubr.bf16.mxu1 %v4958_v16  ;;  %4043 = vmatprep.mubr.bf16.mxu0 %v5000_v2 }
  0xc7   : > { %3996 = vmatmul.mubr.bf16.gmra.mxu1 %v4975_v42  ;;  %4044 = vmatmul.mubr.bf16.gmra.mxu0 %v4652_v33  ;;  %v4466_v33 = vld [vmem:[#allocation5 + $0x1e0] sm:$0xff]  }
  0xc8   : > { %4063 = vmatprep.mubr.bf16.mxu1 %v5136_v47  ;;  %4111 = vmatprep.mubr.bf16.mxu0 %v1172_v19 }
  0xcf   : > { %4064 = vmatmul.mubr.bf16.vlgmr.msra.gmra.mxu1 %v1172_v19  ;;  %4112 = vmatmul.mubr.bf16.vlgmr.msra.gmra.mxu0 %v4987_v57  ;;  %v1275_v19 = vor.u32 %v1274_v63, %v1270_v41  ;;  %v5220_v41 = vsel %vm4819_vm2, %v4912_v48, 0  ;;  %v1332_v63 = vshll.u32 %v4975_v42, 16  ;;  %v1330_v48 = vshrl.u32 %v4975_v42, 16 }
  0xd0   : > { %4144 = vmatpush3.bf16.msra.mxu1 %v4460_v62  ;;  %4192 = vmatpush3.bf16.msra.mxu0 %v4461_v27  ;;  %v1284_v62 = vshll.u32 %v4895_v32, 16  ;;  %v5171_v27 = vsel %vm4819_vm2, %v4856_v54, 0  ;;  %v4474_v54 = vld [vmem:[#allocation5 + $0x1c0] sm:$0xff]  }
  0xd1   : > { %4067 = vmatprep.mubr.bf16.mxu1 %v4987_v57  ;;  %4115 = vmatprep.mubr.bf16.mxu0 %v5010_v7  ;;  %v1289_v44 = vshll.u32 %v5171_v27, 16 }
  0xd2   : > { %4145 = vmatprep.subr.bf16.mxu1 %v4462_v55  ;;  %4193 = vmatprep.subr.bf16.mxu0 %v4463_v58  ;;  %v1286_v43 = vrot.slane %v1284_v62, 1  ;;  %v1320_v62 = vshll.u32 %v4958_v16, 16 }
  0xd4   : > { %4146 = vmatpush3.bf16.msra.mxu1 %v4462_v55  ;;  %4194 = vmatpush3.bf16.msra.mxu0 %v4463_v58  ;;  %v1279_v55 = vrot.slane %v1277_v12, 1  ;;  %v1296_v58 = vshll.u32 %v4930_v61, 16  ;;  %v5226_v12 = vsel %vm4819_vm2, %v4948_v13, 0 }
  0xd5   : > { %4147 = vmatprep.subr.bf16.mxu1 %v4464_v59  ;;  %4195 = vmatprep.subr.bf16.mxu0 %v4465_v51 }
  0xd6   : > { %v5201_v8 = vsel %vm1152_vm3, %v1275_v19, %v1279_v55  ;;  %v1298_v20 = vrot.slane %v1296_v58, 1  ;;  %v1334_v19 = vrot.slane %v1332_v63, 1  ;;  %v1337_v55 = vshll.u32 %v5226_v12, 16  ;;  %v4479_v63 = vld [vmem:[#allocation5 + $0x230] sm:$0xff]  }
  0xd7   : > { %4068 = vmatmul.mubr.bf16.gmra.mxu1 %v5010_v7  ;;  %4116 = vmatmul.mubr.bf16.gmra.mxu0 %v5039_v53 }
  0xd8   : > { %4071 = vmatprep.mubr.bf16.mxu1 %v5039_v53  ;;  %4119 = vmatprep.mubr.bf16.mxu0 %v5055_v11 }
  0xd9   : > { %4148 = vmatpush3.bf16.msra.mxu1 %v4464_v59  ;;  %4196 = vmatpush3.bf16.msra.mxu0 %v4465_v51  ;;  %v1287_v59 = vor.u32 %v1286_v43, %v1282_v10  ;;  %v1291_v51 = vrot.slane %v1289_v44, 1  ;;  %v1318_v43 = vshrl.u32 %v4958_v16, 16  ;;  %v1322_v44 = vrot.slane %v1320_v62, 1 }
  0xda   : > { %4149 = vmatprep.subr.bf16.mxu1 %v4466_v33  ;;  %4197 = vmatprep.subr.bf16.mxu0 %v4467_v0  ;;  %v2178_v62 = vrot.slane %v4832_v30, 1  ;;  %v4482_v30 = vld [vmem:[#allocation5 + $0x160] sm:$0xff]  }
  0xdb   : > { %v1323_v13 = vor.u32 %v1322_v44, %v1318_v43  ;;  %v4487_v43 = vld [vmem:[#allocation5 + $0x210] sm:$0xff]   ;;  %v4490_v44 = vld [vmem:[#allocation5 + $0x140] sm:$0xff]  }
  0xdd   : > { %4150 = vmatpush3.bf16.msra.mxu1 %v4466_v33  ;;  %4198 = vmatpush3.bf16.msra.mxu0 %v4467_v0  ;;  %v5188_v33 = vsel %vm4819_vm2, %v4875_v14, 0  ;;  %v1308_v0 = vshll.u32 %v4939_v46, 16  ;;  %v1294_v14 = vshrl.u32 %v4930_v61, 16 }
  0xde   : > { %4151 = vmatprep.subr.bf16.mxu1 %v4468_v4  ;;  %4199 = vmatprep.subr.bf16.mxu0 %v4469_v5  ;;  %v1301_v23 = vshll.u32 %v5188_v33, 16 }
  0xdf   : > { %4072 = vmatmul.mubr.bf16.gmra.mxu1 %v5055_v11  ;;  %4120 = vmatmul.mubr.bf16.gmra.mxu0 %v5060_v34  ;;  %v1299_v56 = vor.u32 %v1298_v20, %v1294_v14  ;;  %v5246_v14 = vsel %vm4819_vm2, %v4966_v37, 0 }
  0xe0   : > { %4075 = vmatprep.mubr.bf16.mxu1 %v5060_v34  ;;  %4123 = vmatprep.mubr.bf16.mxu0 %v5063_v17  ;;  %v1303_v6 = vrot.slane %v1301_v23, 1  ;;  %v1616_v23 = vshrl.u32 %v5000_v2, 16 }
  0xe1   : > { %4152 = vmatpush3.bf16.msra.mxu1 %v4468_v4  ;;  %4200 = vmatpush3.bf16.msra.mxu0 %v4469_v5  ;;  %v5196_v4 = vld [vmem:[#allocation5 + $0x178] sm:$0xff]  }
  0xe2   : > { %4153 = vmatprep.subr.bf16.mxu1 %v4470_v60  ;;  %4201 = vmatprep.subr.bf16.mxu0 %v4471_v31  ;;  %v5198_v5 = vld [vmem:[#allocation5 + $0x238] sm:$0xff]   ;;  %v5229_v10 = vsel %vm1152_vm3, %v1299_v56, %v1303_v6  ;;  %v2179_v6 = vrot.slane %v5127_v50, 1  ;;  %v4481_v50 = vld [vmem:[#allocation5 + $0x228] sm:$0xff]  }
  0xe5   : > { %4154 = vmatpush3.bf16.msra.mxu1 %v4470_v60  ;;  %4202 = vmatpush3.bf16.msra.mxu0 %v4471_v31  ;;  %v5206_v60 = vsel %vm1152_vm3, %v1287_v59, %v1291_v51  ;;  %v1310_v31 = vrot.slane %v1308_v0, 1  ;;  %v1618_v59 = vshll.u32 %v5000_v2, 16  ;;  %v1335_v51 = vor.u32 %v1334_v19, %v1330_v48 }
  0xe6   : > { %4155 = vmatprep.subr.bf16.mxu1 %v4472_v35  ;;  %4203 = vmatprep.subr.bf16.mxu0 %v4473_v15  ;;  %v1339_v0 = vrot.slane %v1337_v55, 1  ;;  %v2205_v48 = vrot.slane %v4887_v29, 1  ;;  %v2206_v19 = vrot.slane %v5165_v26, 1  ;;  %v2208_v29 = vrot.slane %v4895_v32, 1 }
  0xe7   : > { %4076 = vmatmul.mubr.bf16.gmra.mxu1 %v5063_v17  ;;  %4124 = vmatmul.mubr.bf16.gmra.mxu0 %v5066_v40 }
  0xe8   : > { %4079 = vmatprep.mubr.bf16.mxu1 %v5066_v40  ;;  %4127 = vmatprep.mubr.bf16.mxu0 %v5176_v49  ;;  %v5298_v55 = vsel %vm2175_vm4, %v2205_v48, %v2206_v19 }
  0xe9   : > { %4156 = vmatpush3.bf16.msra.mxu1 %v4472_v35  ;;  %4204 = vmatpush3.bf16.msra.mxu0 %v4473_v15  ;;  %v1311_v35 = vor.u32 %v1310_v31, %v1306_v24  ;;  %v1315_v15 = vrot.slane %v1313_v22, 1  ;;  %v1620_v24 = vrot.slane %v1618_v59, 1  ;;  %v1623_v31 = vshll.u32 %v5246_v14, 16 }
  0xea   : > { %4157 = vmatprep.subr.bf16.mxu1 %v4474_v54  ;;  %4205 = vmatprep.subr.bf16.mxu0 %v4475_v45  ;;  %v5254_v22 = vsel %vm1152_vm3, %v1335_v51, %v1339_v0  ;;  %v2212_v59 = vrot.slane %v5188_v33, 1  ;;  %v2215_v33 = vrot.slane %v5194_v1, 1 }
  0xeb   : > { %v1621_v21 = vor.u32 %v1620_v24, %v1616_v23  ;;  %v1625_v37 = vrot.slane %v1623_v31, 1 }
  0xed   : > { %4158 = vmatpush3.bf16.msra.mxu1 %v4474_v54  ;;  %4206 = vmatpush3.bf16.msra.mxu0 %v4475_v45  ;;  %v1325_v54 = vshll.u32 %v5220_v41, 16  ;;  %v5234_v45 = vsel %vm1152_vm3, %v1311_v35, %v1315_v15  ;;  %v5261_v56 = vsel %vm1152_vm3, %v1621_v21, %v1625_v37  ;;  %v5270_v35 = vsel %vm2175_vm4, %v2178_v62, %v2179_v6  ;;  %v4478_v15 = vld [vmem:[#allocation5 + $0x170] sm:$0xff]  }
  0xee   : > { %4239 = vmatprep.subr.bf16.mxu1 %v5196_v4  ;;  %4287 = vmatprep.subr.bf16.mxu0 %v5198_v5  ;;  %v2217_v37 = vrot.slane %v4958_v16, 1  ;;  %v2218_v6 = vrot.slane %v5220_v41, 1  ;;  %v2220_v16 = vrot.slane %v4975_v42, 1  ;;  %v2221_v41 = vrot.slane %v5226_v12, 1 }
  0xef   : > { %4080 = vmatmul.mubr.bf16.gmra.mxu1 %v5176_v49  ;;  %4128 = vmatmul.mubr.bf16.gmra.mxu0 %v5201_v8  ;;  %v1327_v58 = vrot.slane %v1325_v54, 1  ;;  %v4491_v54 = vld [vmem:[#allocation5 + $0x200] sm:$0xff]  }
  0xf0   : > { %4083 = vmatprep.mubr.bf16.mxu1 %v5201_v8  ;;  %4131 = vmatprep.mubr.bf16.mxu0 %v5206_v60  ;;  %v5358_v1 = vsel %vm2175_vm4, %v2217_v37, %v2218_v6 }
  0xf1   : > { %v5249_v20 = vsel %vm1152_vm3, %v1323_v13, %v1327_v58  ;;  %v2211_v58 = vrot.slane %v4930_v61, 1  ;;  %v2214_v61 = vrot.slane %v4939_v46, 1 }
  0xf7   : > { %4084 = vmatmul.mubr.bf16.gmra.mxu1 %v5206_v60  ;;  %4132 = vmatmul.mubr.bf16.gmra.mxu0 %v5229_v10 }
  0xf8   : > { %4087 = vmatprep.mubr.bf16.mxu1 %v5229_v10  ;;  %4135 = vmatprep.mubr.bf16.mxu0 %v5234_v45 }
  0xff   : > { %4088 = vmatmul.mubr.bf16.gmra.mxu1 %v5234_v45  ;;  %4136 = vmatmul.mubr.bf16.gmra.mxu0 %v5249_v20 }
 0x100   : > { %4091 = vmatprep.mubr.bf16.mxu1 %v5249_v20  ;;  %4139 = vmatprep.mubr.bf16.mxu0 %v5254_v22 }
 0x107   : > { %4092 = vmatmul.mubr.bf16.gmra.mxu1 %v5254_v22  ;;  %4140 = vmatmul.mubr.bf16.gmra.mxu0 %v5261_v56 }
 0x108   : > { %4159 = vmatprep.mubr.bf16.mxu1 %v4987_v57  ;;  %4207 = vmatprep.mubr.bf16.mxu0 %v5136_v47  ;;  %v4480_v57 = vld [vmem:[#allocation5 + $0x168] sm:$0xff]  }
 0x10f   : > { %4160 = vmatmul.mubr.bf16.vlgmr.msra.gmra.mxu1 %v5010_v7  ;;  %4208 = vmatmul.mubr.bf16.vlgmr.msra.gmra.mxu0 %v5270_v35  ;;  %v4483_v7 = vld [vmem:[#allocation5 + $0x220] sm:$0xff]  }
 0x110   : > { %4240 = vmatpush3.bf16.msra.mxu1 %v5196_v4  ;;  %4288 = vmatpush3.bf16.msra.mxu0 %v5198_v5  ;;  %v4485_v4 = vld [vmem:[#allocation5 + $0x218] sm:$0xff]   ;;  %v4486_v5 = vld [vmem:[#allocation5 + $0x150] sm:$0xff]  }
 0x111   : > { %4163 = vmatprep.mubr.bf16.mxu1 %v5039_v53  ;;  %4211 = vmatprep.mubr.bf16.mxu0 %v5081_v9  ;;  %v4484_v53 = vld [vmem:[#allocation5 + $0x158] sm:$0xff]  }
 0x112   : > { %4241 = vmatprep.subr.bf16.mxu1 %v4478_v15  ;;  %4289 = vmatprep.subr.bf16.mxu0 %v4479_v63 }
 0x114   : > { %4242 = vmatpush3.bf16.msra.mxu1 %v4478_v15  ;;  %4290 = vmatpush3.bf16.msra.mxu0 %v4479_v63 }
 0x115   : > { %4243 = vmatprep.subr.bf16.mxu1 %v4480_v57  ;;  %4291 = vmatprep.subr.bf16.mxu0 %v4481_v50 }
 0x117   : > { %4164 = vmatmul.mubr.bf16.gmra.mxu1 %v5055_v11  ;;  %4212 = vmatmul.mubr.bf16.gmra.mxu0 %v5086_v28  ;;  %v4488_v11 = vld [vmem:[#allocation5 + $0x148] sm:$0xff]  }
 0x118   : > { %4167 = vmatprep.mubr.bf16.mxu1 %v5060_v34  ;;  %4215 = vmatprep.mubr.bf16.mxu0 %v5093_v52  ;;  %v4489_v34 = vld [vmem:[#allocation5 + $0x208] sm:$0xff]  }
 0x119   : > { %4244 = vmatpush3.bf16.msra.mxu1 %v4480_v57  ;;  %4292 = vmatpush3.bf16.msra.mxu0 %v4481_v50 }
 0x11a   : > { %4245 = vmatprep.subr.bf16.mxu1 %v4482_v30  ;;  %4293 = vmatprep.subr.bf16.mxu0 %v4483_v7 }
 0x11d   : > { %4246 = vmatpush3.bf16.msra.mxu1 %v4482_v30  ;;  %4294 = vmatpush3.bf16.msra.mxu0 %v4483_v7 }
 0x11e   : > { %4247 = vmatprep.subr.bf16.mxu1 %v4484_v53  ;;  %4295 = vmatprep.subr.bf16.mxu0 %v4485_v4 }
 0x11f   : > { %4168 = vmatmul.mubr.bf16.gmra.mxu1 %v5063_v17  ;;  %4216 = vmatmul.mubr.bf16.gmra.mxu0 %v5101_v25  ;;  %v2202_v17 = vrot.slane %v4840_v36, 1 }
 0x120   : > { %4171 = vmatprep.mubr.bf16.mxu1 %v5066_v40  ;;  %4219 = vmatprep.mubr.bf16.mxu0 %v5105_v39  ;;  %v2203_v40 = vrot.slane %v5153_v3, 1  ;;  %v2209_v3 = vrot.slane %v5171_v27, 1  ;;  %v5328_v27 = vsel %vm2175_vm4, %v2211_v58, %v2212_v59 }
 0x121   : > { %4248 = vmatpush3.bf16.msra.mxu1 %v4484_v53  ;;  %4296 = vmatpush3.bf16.msra.mxu0 %v4485_v4 }
 0x122   : > { %4249 = vmatprep.subr.bf16.mxu1 %v4486_v5  ;;  %4297 = vmatprep.subr.bf16.mxu0 %v4487_v43 }
 0x125   : > { %4250 = vmatpush3.bf16.msra.mxu1 %v4486_v5  ;;  %4298 = vmatpush3.bf16.msra.mxu0 %v4487_v43 }
 0x126   : > { %4251 = vmatprep.subr.bf16.mxu1 %v4488_v11  ;;  %4299 = vmatprep.subr.bf16.mxu0 %v4489_v34 }
 0x127   : > { %4172 = vmatmul.mubr.bf16.gmra.mxu1 %v5176_v49  ;;  %4220 = vmatmul.mubr.bf16.gmra.mxu0 %v5110_v38  ;;  %v5295_v49 = vsel %vm2175_vm4, %v2202_v17, %v2203_v40 }
 0x128   : > { %4175 = vmatprep.mubr.bf16.mxu1 %v5201_v8  ;;  %4223 = vmatprep.mubr.bf16.mxu0 %v5113_v18 }
 0x129   : > { %4252 = vmatpush3.bf16.msra.mxu1 %v4488_v11  ;;  %4300 = vmatpush3.bf16.msra.mxu0 %v4489_v34 }
 0x12a   : > { %4253 = vmatprep.subr.bf16.mxu1 %v4490_v44  ;;  %4301 = vmatprep.subr.bf16.mxu0 %v4491_v54 }
 0x12d   : > { %4254 = vmatpush3.bf16.msra.mxu1 %v4490_v44  ;;  %4302 = vmatpush3.bf16.msra.mxu0 %v4491_v54 }
 0x12f   : > { %v5300_v8 = vpop.f32.mrf.mxu0  ;;  %v5302_v36 = vpop.f32.mrf.mxu1  ;;  %4176 = vmatmul.mubr.bf16.gmra.mxu1 %v5206_v60  ;;  %4224 = vmatmul.mubr.bf16.gmra.mxu0 %v5295_v49 }
 0x130   : > { %4179 = vmatprep.mubr.bf16.mxu1 %v5229_v10  ;;  %4227 = vmatprep.mubr.bf16.mxu0 %v5298_v55  ;;  %v5321_v10 = vsel %vm2175_vm4, %v2208_v29, %v2209_v3 }
 0x131   : > { %v5310_v26 = vpop.f32.mrf.mxu0  ;;  %v5312_v13 = vpop.f32.mrf.mxu1 }
 0x133   : > { %v5316_v51 = vpop.f32.mrf.mxu0  ;;  %v5318_v60 = vpop.f32.mrf.mxu1 }
 0x135   : > { %v5323_v0 = vpop.f32.mrf.mxu0  ;;  %v5325_v32 = vpop.f32.mrf.mxu1 }
 0x137   : > { %v5330_v23 = vpop.f32.mrf.mxu0  ;;  %v5332_v24 = vpop.f32.mrf.mxu1  ;;  %4180 = vmatmul.mubr.bf16.gmra.mxu1 %v5234_v45  ;;  %4228 = vmatmul.mubr.bf16.gmra.mxu0 %v5321_v10 }
 0x138   : > { %4183 = vmatprep.mubr.bf16.mxu1 %v5249_v20  ;;  %4231 = vmatprep.mubr.bf16.mxu0 %v5328_v27  ;;  %v5351_v20 = vsel %vm2175_vm4, %v2214_v61, %v2215_v33 }
 0x139   : > { %v5340_v31 = vpop.f32.mrf.mxu0  ;;  %v5342_v21 = vpop.f32.mrf.mxu1 }
 0x13b   : > { %v5346_v62 = vpop.f32.mrf.mxu0  ;;  %v5348_v45 = vpop.f32.mrf.mxu1 }
 0x13d   : > { %v5353_v15 = vpop.f32.mrf.mxu0  ;;  %v5355_v46 = vpop.f32.mrf.mxu1 }
 0x13f   : > { %v5360_v63 = vpop.f32.mrf.mxu0  ;;  %v5362_v57 = vpop.f32.mrf.mxu1  ;;  %4184 = vmatmul.mubr.bf16.gmra.mxu1 %v5254_v22  ;;  %4232 = vmatmul.mubr.bf16.gmra.mxu0 %v5351_v20  ;;  %v5379_v22 = vsel %vm2175_vm4, %v2220_v16, %v2221_v41 }
 0x140   : > { %4187 = vmatprep.mubr.bf16.mxu1 %v5261_v56  ;;  %4235 = vmatprep.mubr.bf16.mxu0 %v5358_v1 }
 0x141   : > { %v5370_v50 = vpop.f32.mrf.mxu0  ;;  %v5372_v30 = vpop.f32.mrf.mxu1 }
 0x143   : > { %v5374_v7 = vpop.f32.mrf.mxu0  ;;  %v5376_v53 = vpop.f32.mrf.mxu1 }
 0x145   : > { %v5381_v4 = vpop.f32.mrf.mxu0  ;;  %v5383_v56 = vpop.f32.mrf.mxu1 }
 0x147   : > { %v5385_v5 = vpop.f32.mrf.mxu0  ;;  %v5387_v42 = vpop.f32.mrf.mxu1  ;;  %4188 = vmatmul.mubr.bf16.gmra.mxu1 %v5136_v47  ;;  %4236 = vmatmul.mubr.bf16.gmra.mxu0 %v5379_v22 }
 0x148   : > { %4255 = vmatprep.mubr.bf16.mxu1 %v5270_v35  ;;  %4303 = vmatprep.mubr.bf16.mxu0 %v5081_v9 }
 0x149   : > { %v5393_v12 = vpop.f32.mrf.mxu0  ;;  %v5395_v43 = vpop.f32.mrf.mxu1 }
 0x14b   : > { %v5397_v11 = vpop.f32.mrf.mxu0  ;;  %v5399_v34 = vpop.f32.mrf.mxu1 }
 0x14d   : > { %v5401_v44 = vpop.f32.mrf.mxu0  ;;  %v5403_v54 = vpop.f32.mrf.mxu1 }
 0x14f   : > { %v3969_v17 = vpop.f32.mrf.mxu1  ;;  %v4017_v40 = vpop.f32.mrf.mxu0  ;;  %4256 = vmatmul.mubr.bf16.vlgmr.msra.gmra.mxu1 %v5081_v9  ;;  %4304 = vmatmul.mubr.bf16.vlgmr.msra.gmra.mxu0 %v5086_v28 }
 0x150   : > { %v776_v35 = vadd.f32 %v3969_v17, %v5300_v8  ;;  %4259 = vmatprep.mubr.bf16.mxu1 %v5086_v28  ;;  %4307 = vmatprep.mubr.bf16.mxu0 %v5093_v52 }
 0x151   : > { %v767_v48 = vpop.f32.mrf.mxu1  ;;  %v993_v19 = vpop.f32.mrf.mxu0 }
 0x152   : > { %v5410_v29 = vadd.f32 %v4017_v40, %v776_v35  ;;  %v768_v3 = vadd.f32 %v767_v48, %v5310_v26 }
 0x153   : > { %v3970_v58 = vpop.f32.mrf.mxu1  ;;  %v4018_v59 = vpop.f32.mrf.mxu0 }
 0x154   : > { %v5413_v61 = vadd.f32 %v993_v19, %v768_v3  ;;  %v779_v9 = vadd.f32 %v3970_v58, %v5316_v51 }
 0x155   : > { %v770_v33 = vpop.f32.mrf.mxu1  ;;  %v996_v37 = vpop.f32.mrf.mxu0 }
 0x156   : > { %v5416_v6 = vadd.f32 %v4018_v59, %v779_v9  ;;  %v771_v28 = vadd.f32 %v770_v33, %v5323_v0 }
 0x157   : > { %v3973_v8 = vpop.f32.mrf.mxu1  ;;  %v4021_v16 = vpop.f32.mrf.mxu0  ;;  %4260 = vmatmul.mubr.bf16.gmra.mxu1 %v5093_v52  ;;  %4308 = vmatmul.mubr.bf16.gmra.mxu0 %v5101_v25 }
 0x158   : > { %v5421_v41 = vadd.f32 %v996_v37, %v771_v28  ;;  %v792_v26 = vadd.f32 %v3973_v8, %v5330_v23  ;;  %4263 = vmatprep.mubr.bf16.mxu1 %v5101_v25  ;;  %4311 = vmatprep.mubr.bf16.mxu0 %v5105_v39 }
 0x159   : > { %v783_v51 = vpop.f32.mrf.mxu1  ;;  %v1009_v17 = vpop.f32.mrf.mxu0 }
 0x15a   : > { %v5426_v40 = vadd.f32 %v4021_v16, %v792_v26  ;;  %v784_v0 = vadd.f32 %v783_v51, %v5340_v31 }
 0x15b   : > { %v3974_v35 = vpop.f32.mrf.mxu1  ;;  %v4022_v48 = vpop.f32.mrf.mxu0 }
 0x15c   : > { %v5429_v19 = vadd.f32 %v1009_v17, %v784_v0  ;;  %v795_v52 = vadd.f32 %v3974_v35, %v5346_v62 }
 0x15d   : > { %v786_v3 = vpop.f32.mrf.mxu1  ;;  %v1012_v58 = vpop.f32.mrf.mxu0 }
 0x15e   : > { %v5432_v59 = vadd.f32 %v4022_v48, %v795_v52  ;;  %v787_v25 = vadd.f32 %v786_v3, %v5353_v15 }
 0x15f   : > { %v3977_v23 = vpop.f32.mrf.mxu1  ;;  %v4025_v9 = vpop.f32.mrf.mxu0  ;;  %4264 = vmatmul.mubr.bf16.gmra.mxu1 %v5105_v39  ;;  %4312 = vmatmul.mubr.bf16.gmra.mxu0 %v5110_v38 }
 0x160   : > { %v5437_v33 = vadd.f32 %v1012_v58, %v787_v25  ;;  %v808_v31 = vadd.f32 %v3977_v23, %v5360_v63  ;;  %4267 = vmatprep.mubr.bf16.mxu1 %v5110_v38  ;;  %4315 = vmatprep.mubr.bf16.mxu0 %v5113_v18 }
 0x161   : > { %v799_v62 = vpop.f32.mrf.mxu1  ;;  %v1025_v37 = vpop.f32.mrf.mxu0 }
 0x162   : > { %v5442_v28 = vadd.f32 %v4025_v9, %v808_v31  ;;  %v800_v15 = vadd.f32 %v799_v62, %v5370_v50 }
 0x163   : > { %v3978_v8 = vpop.f32.mrf.mxu1  ;;  %v4026_v16 = vpop.f32.mrf.mxu0 }
 0x164   : > { %v5445_v26 = vadd.f32 %v1025_v37, %v800_v15  ;;  %v811_v39 = vadd.f32 %v3978_v8, %v5374_v7 }
 0x165   : > { %v802_v51 = vpop.f32.mrf.mxu1  ;;  %v1028_v17 = vpop.f32.mrf.mxu0 }
 0x166   : > { %v5448_v0 = vadd.f32 %v4026_v16, %v811_v39  ;;  %v803_v38 = vadd.f32 %v802_v51, %v5381_v4 }
 0x167   : > { %v3981_v63 = vpop.f32.mrf.mxu1  ;;  %v4029_v35 = vpop.f32.mrf.mxu0  ;;  %4268 = vmatmul.mubr.bf16.gmra.mxu1 %v5113_v18  ;;  %4316 = vmatmul.mubr.bf16.gmra.mxu0 %v5295_v49 }
 0x168   : > { %v5453_v48 = vadd.f32 %v1028_v17, %v803_v38  ;;  %v824_v50 = vadd.f32 %v3981_v63, %v5385_v5  ;;  %4271 = vmatprep.mubr.bf16.mxu1 %v5295_v49  ;;  %4319 = vmatprep.mubr.bf16.mxu0 %v5298_v55 }
 0x169   : > { %v815_v7 = vpop.f32.mrf.mxu1  ;;  %v1041_v52 = vpop.f32.mrf.mxu0 }
 0x16a   : > { %v5458_v3 = vadd.f32 %v4029_v35, %v824_v50  ;;  %v816_v4 = vadd.f32 %v815_v7, %v5393_v12 }
 0x16b   : > { %v3982_v58 = vpop.f32.mrf.mxu1  ;;  %v4030_v25 = vpop.f32.mrf.mxu0 }
 0x16c   : > { %v5461_v23 = vadd.f32 %v1041_v52, %v816_v4  ;;  %v827_v18 = vadd.f32 %v3982_v58, %v5397_v11  ;;  %v2499_v4 = vrot.slane %v5000_v2, 1 }
 0x16d   : > { %v818_v9 = vpop.f32.mrf.mxu1  ;;  %v1044_v31 = vpop.f32.mrf.mxu0 }
 0x16e   : > { %v5464_v62 = vadd.f32 %v4030_v25, %v827_v18  ;;  %v819_v49 = vadd.f32 %v818_v9, %v5401_v44 }
 0x16f   : > { %v3985_v5 = vpop.f32.mrf.mxu1  ;;  %v4033_v37 = vpop.f32.mrf.mxu0  ;;  %4272 = vmatmul.mubr.bf16.gmra.mxu1 %v5298_v55  ;;  %4320 = vmatmul.mubr.bf16.gmra.mxu0 %v5321_v10 }
 0x170   : > { %v5469_v15 = vadd.f32 %v1044_v31, %v819_v49  ;;  %v840_v12 = vadd.f32 %v3985_v5, %v5302_v36  ;;  %4275 = vmatprep.mubr.bf16.mxu1 %v5321_v10  ;;  %4323 = vmatprep.mubr.bf16.mxu0 %v5328_v27 }
 0x171   : > { %v831_v11 = vpop.f32.mrf.mxu1  ;;  %v1057_v8 = vpop.f32.mrf.mxu0 }
 0x172   : > { %v5474_v16 = vadd.f32 %v4033_v37, %v840_v12  ;;  %v832_v44 = vadd.f32 %v831_v11, %v5312_v13 }
 0x173   : > { %v3986_v39 = vpop.f32.mrf.mxu1  ;;  %v4034_v51 = vpop.f32.mrf.mxu0 }
 0x174   : > { %v5477_v17 = vadd.f32 %v1057_v8, %v832_v44  ;;  %v843_v55 = vadd.f32 %v3986_v39, %v5318_v60 }
 0x175   : > { %v834_v38 = vpop.f32.mrf.mxu1  ;;  %v1060_v63 = vpop.f32.mrf.mxu0 }
 0x176   : > { %v5480_v35 = vadd.f32 %v4034_v51, %v843_v55  ;;  %v835_v36 = vadd.f32 %v834_v38, %v5325_v32  ;;  %v2500_v32 = vrot.slane %v5246_v14, 1 }
 0x177   : > { %v3989_v10 = vpop.f32.mrf.mxu1  ;;  %v4037_v50 = vpop.f32.mrf.mxu0  ;;  %4276 = vmatmul.mubr.bf16.gmra.mxu1 %v5328_v27  ;;  %4324 = vmatmul.mubr.bf16.gmra.mxu0 %v5351_v20 }
 0x178   : > { %v5485_v7 = vadd.f32 %v1060_v63, %v835_v36  ;;  %v856_v13 = vadd.f32 %v3989_v10, %v5332_v24  ;;  %4279 = vmatprep.mubr.bf16.mxu1 %v5351_v20  ;;  %4327 = vmatprep.mubr.bf16.mxu0 %v5358_v1  ;;  %v2501_v49 = vsel %vm2175_vm4, %v2499_v4, %v2500_v32 }
 0x179   : > { %v847_v60 = vpop.f32.mrf.mxu1  ;;  %v1073_v52 = vpop.f32.mrf.mxu0 }
 0x17a   : > { %v5492_v58 = vadd.f32 %v4037_v50, %v856_v13  ;;  %v848_v27 = vadd.f32 %v847_v60, %v5342_v21 }
 0x17b   : > { %v3990_v25 = vpop.f32.mrf.mxu1  ;;  %v4038_v18 = vpop.f32.mrf.mxu0 }
 0x17c   : > { %v5495_v9 = vadd.f32 %v1073_v52, %v848_v27  ;;  %v859_v24 = vadd.f32 %v3990_v25, %v5348_v45 }
 0x17d   : > { %v850_v31 = vpop.f32.mrf.mxu1  ;;  %v1076_v20 = vpop.f32.mrf.mxu0 }
 0x17e   : > { %v5499_v5 = vadd.f32 %v4038_v18, %v859_v24  ;;  %v851_v2 = vadd.f32 %v850_v31, %v5355_v46 }
 0x17f   : > { %v3993_v37 = vpop.f32.mrf.mxu1  ;;  %v4041_v14 = vpop.f32.mrf.mxu0  ;;  %4280 = vmatmul.mubr.bf16.gmra.mxu1 %v5358_v1  ;;  %4328 = vmatmul.mubr.bf16.gmra.mxu0 %v5379_v22 }
 0x180   : > { %v5504_v21 = vadd.f32 %v1076_v20, %v851_v2  ;;  %v872_v12 = vadd.f32 %v3993_v37, %v5362_v57  ;;  %4283 = vmatprep.mubr.bf16.mxu1 %v5379_v22  ;;  %4331 = vmatprep.mubr.bf16.mxu0 %v2501_v49 }
 0x181   : > { %v863_v45 = vpop.f32.mrf.mxu1  ;;  %v1089_v11 = vpop.f32.mrf.mxu0 }
 0x182   : > { %v5508_v8 = vadd.f32 %v4041_v14, %v872_v12  ;;  %v864_v44 = vadd.f32 %v863_v45, %v5372_v30 }
 0x183   : > { %v3994_v46 = vpop.f32.mrf.mxu1  ;;  %v4042_v39 = vpop.f32.mrf.mxu0 }
 0x184   : > { %v5511_v51 = vadd.f32 %v1089_v11, %v864_v44  ;;  %v875_v1 = vadd.f32 %v3994_v46, %v5376_v53 }
 0x185   : > { %v866_v55 = vpop.f32.mrf.mxu1  ;;  %v1092_v38 = vpop.f32.mrf.mxu0 }
 0x186   : > { %v5514_v63 = vadd.f32 %v4042_v39, %v875_v1  ;;  %v867_v57 = vadd.f32 %v866_v55, %v5383_v56 }
 0x187   : > { %v3997_v22 = vpop.f32.mrf.mxu1  ;;  %v4045_v36 = vpop.f32.mrf.mxu0  ;;  %4284 = vmatmul.mubr.bf16.gmra.mxu1 %v2501_v49  ;;  %4332 = vmatmul.mubr.bf16.gmra.mxu0 %v5136_v47 }
 0x188   : > { %v5518_v10 = vadd.f32 %v1092_v38, %v867_v57  ;;  %v888_v30 = vadd.f32 %v3997_v22, %v5387_v42 }
 0x189   : > { %v879_v50 = vpop.f32.mrf.mxu1  ;;  %v1105_v13 = vpop.f32.mrf.mxu0 }
 0x18a   : > { %v5521_v60 = vadd.f32 %v4045_v36, %v888_v30  ;;  %v880_v53 = vadd.f32 %v879_v50, %v5395_v43 }
 0x18b   : > { %v3998_v52 = vpop.f32.mrf.mxu1  ;;  %v4046_v4 = vpop.f32.mrf.mxu0 }
 0x18c   : > { %v5524_v32 = vadd.f32 %v1105_v13, %v880_v53  ;;  %v891_v56 = vadd.f32 %v3998_v52, %v5399_v34 }
 0x18d   : > { %v882_v27 = vpop.f32.mrf.mxu1  ;;  %v1108_v25 = vpop.f32.mrf.mxu0 }
 0x18e   : > { %v5527_v18 = vadd.f32 %v4046_v4, %v891_v56  ;;  %v883_v47 = vadd.f32 %v882_v27, %v5403_v54 }
 0x18f   : > { %v4065_v24 = vpop.f32.mrf.mxu1  ;;  %v4113_v42 = vpop.f32.mrf.mxu0 }
 0x190   : > { %v5530_v31 = vadd.f32 %v1108_v25, %v883_v47  ;;  %v1585_v20 = vadd.f32 %v4065_v24, %v5410_v29 }
 0x191   : > { %v1456_v49 = vpop.f32.mrf.mxu1  ;;  %v1727_v43 = vpop.f32.mrf.mxu0 }
 0x192   : > { %v5533_v2 = vadd.f32 %v4113_v42, %v1585_v20  ;;  %v1583_v37 = vadd.f32 %v1456_v49, %v5413_v61 }
 0x193   : > { %v4066_v14 = vpop.f32.mrf.mxu1  ;;  %v4114_v34 = vpop.f32.mrf.mxu0 }
 0x194   : > { %v5536_v12 = vadd.f32 %v1727_v43, %v1583_v37  ;;  %v1586_v45 = vadd.f32 %v4066_v14, %v5416_v6 }
 0x195   : > { %v1459_v11 = vpop.f32.mrf.mxu1  ;;  %v1730_v54 = vpop.f32.mrf.mxu0 }
 0x196   : > { %v5539_v44 = vadd.f32 %v4114_v34, %v1586_v45  ;;  %v1584_v46 = vadd.f32 %v1459_v11, %v5421_v41 }
 0x197   : > { %v4069_v39 = vpop.f32.mrf.mxu1  ;;  %v4117_v29 = vpop.f32.mrf.mxu0 }
 0x198   : > { %v5542_v1 = vadd.f32 %v1730_v54, %v1584_v46  ;;  %v1589_v55 = vadd.f32 %v4069_v39, %v5426_v40 }
 0x199   : > { %v1472_v38 = vpop.f32.mrf.mxu1  ;;  %v1743_v61 = vpop.f32.mrf.mxu0 }
 0x19a   : > { %v5545_v57 = vadd.f32 %v4117_v29, %v1589_v55  ;;  %v1587_v22 = vadd.f32 %v1472_v38, %v5429_v19 }
 0x19b   : > { %v4070_v36 = vpop.f32.mrf.mxu1  ;;  %v4118_v6 = vpop.f32.mrf.mxu0 }
 0x19c   : > { %v5548_v30 = vadd.f32 %v1743_v61, %v1587_v22  ;;  %v1590_v50 = vadd.f32 %v4070_v36, %v5432_v59 }
 0x19d   : > { %v1475_v13 = vpop.f32.mrf.mxu1  ;;  %v1746_v41 = vpop.f32.mrf.mxu0 }
 0x19e   : > { %v5551_v53 = vadd.f32 %v4118_v6, %v1590_v50  ;;  %v1588_v52 = vadd.f32 %v1475_v13, %v5437_v33 }
 0x19f   : > { %v4073_v4 = vpop.f32.mrf.mxu1  ;;  %v4121_v40 = vpop.f32.mrf.mxu0 }
 0x1a0   : > { %v5554_v56 = vadd.f32 %v1746_v41, %v1588_v52  ;;  %v1593_v27 = vadd.f32 %v4073_v4, %v5442_v28 }
 0x1a1   : > { %v1488_v25 = vpop.f32.mrf.mxu1  ;;  %v1759_v19 = vpop.f32.mrf.mxu0 }
 0x1a2   : > { %v5557_v47 = vadd.f32 %v4121_v40, %v1593_v27  ;;  %v1591_v24 = vadd.f32 %v1488_v25, %v5445_v26 }
 0x1a3   : > { %v4074_v42 = vpop.f32.mrf.mxu1  ;;  %v4122_v59 = vpop.f32.mrf.mxu0 }
 0x1a4   : > { %v5560_v20 = vadd.f32 %v1759_v19, %v1591_v24  ;;  %v1594_v49 = vadd.f32 %v4074_v42, %v5448_v0 }
 0x1a5   : > { %v1491_v43 = vpop.f32.mrf.mxu1  ;;  %v1762_v33 = vpop.f32.mrf.mxu0 }
 0x1a6   : > { %v5563_v37 = vadd.f32 %v4122_v59, %v1594_v49  ;;  %v1592_v14 = vadd.f32 %v1491_v43, %v5453_v48 }
 0x1a7   : > { %v4077_v34 = vpop.f32.mrf.mxu1  ;;  %v4125_v28 = vpop.f32.mrf.mxu0 }
 0x1a8   : > { %v5566_v45 = vadd.f32 %v1762_v33, %v1592_v14  ;;  %v1597_v11 = vadd.f32 %v4077_v34, %v5458_v3 }
 0x1a9   : > { %v1504_v54 = vpop.f32.mrf.mxu1  ;;  %v1775_v26 = vpop.f32.mrf.mxu0 }
 0x1aa   : > { %v5569_v46 = vadd.f32 %v4125_v28, %v1597_v11  ;;  %v1595_v39 = vadd.f32 %v1504_v54, %v5461_v23 }
 0x1ab   : > { %v4078_v29 = vpop.f32.mrf.mxu1  ;;  %v4126_v0 = vpop.f32.mrf.mxu0 }
 0x1ac   : > { %v5572_v55 = vadd.f32 %v1775_v26, %v1595_v39  ;;  %v1598_v38 = vadd.f32 %v4078_v29, %v5464_v62 }
 0x1ad   : > { %v1507_v61 = vpop.f32.mrf.mxu1  ;;  %v1778_v48 = vpop.f32.mrf.mxu0 }
 0x1ae   : > { %v5575_v22 = vadd.f32 %v4126_v0, %v1598_v38  ;;  %v1596_v36 = vadd.f32 %v1507_v61, %v5469_v15 }
 0x1af   : > { %v4081_v6 = vpop.f32.mrf.mxu1  ;;  %v4129_v3 = vpop.f32.mrf.mxu0 }
 0x1b0   : > { %v5578_v50 = vadd.f32 %v1778_v48, %v1596_v36  ;;  %v1601_v13 = vadd.f32 %v4081_v6, %v5474_v16 }
 0x1b1   : > { %v1520_v41 = vpop.f32.mrf.mxu1  ;;  %v1791_v23 = vpop.f32.mrf.mxu0 }
 0x1b2   : > { %v5581_v52 = vadd.f32 %v4129_v3, %v1601_v13  ;;  %v1599_v4 = vadd.f32 %v1520_v41, %v5477_v17 }
 0x1b3   : > { %v4082_v40 = vpop.f32.mrf.mxu1  ;;  %v4130_v62 = vpop.f32.mrf.mxu0 }
 0x1b4   : > { %v5584_v27 = vadd.f32 %v1791_v23, %v1599_v4  ;;  %v1602_v25 = vadd.f32 %v4082_v40, %v5480_v35 }
 0x1b5   : > { %v1523_v19 = vpop.f32.mrf.mxu1  ;;  %v1794_v15 = vpop.f32.mrf.mxu0 }
 0x1b6   : > { %v5587_v24 = vadd.f32 %v4130_v62, %v1602_v25  ;;  %v1600_v42 = vadd.f32 %v1523_v19, %v5485_v7 }
 0x1b7   : > { %v4085_v59 = vpop.f32.mrf.mxu1  ;;  %v4133_v16 = vpop.f32.mrf.mxu0 }
 0x1b8   : > { %v5590_v49 = vadd.f32 %v1794_v15, %v1600_v42  ;;  %v1605_v43 = vadd.f32 %v4085_v59, %v5492_v58 }
 0x1b9   : > { %v1536_v33 = vpop.f32.mrf.mxu1  ;;  %v1807_v17 = vpop.f32.mrf.mxu0 }
 0x1ba   : > { %v5593_v14 = vadd.f32 %v4133_v16, %v1605_v43  ;;  %v1603_v34 = vadd.f32 %v1536_v33, %v5495_v9 }
 0x1bb   : > { %v4086_v28 = vpop.f32.mrf.mxu1  ;;  %v4134_v35 = vpop.f32.mrf.mxu0 }
 0x1bc   : > { %v5596_v11 = vadd.f32 %v1807_v17, %v1603_v34  ;;  %v1606_v54 = vadd.f32 %v4086_v28, %v5499_v5 }
 0x1bd   : > { %v1539_v26 = vpop.f32.mrf.mxu1  ;;  %v1810_v7 = vpop.f32.mrf.mxu0 }
 0x1be   : > { %5940 = vst [vmem:[#allocation14_spill] sm:$0xff] %v5596_v11  ;;  %v5599_v39 = vadd.f32 %v4134_v35, %v1606_v54  ;;  %v1604_v29 = vadd.f32 %v1539_v26, %v5504_v21 }
 0x1bf   : > { %v4089_v0 = vpop.f32.mrf.mxu1  ;;  %v4137_v58 = vpop.f32.mrf.mxu0 }
 0x1c0   : > { %5941 = vst [vmem:[#allocation15_spill] sm:$0xff] %v5599_v39  ;;  %v5602_v38 = vadd.f32 %v1810_v7, %v1604_v29  ;;  %v1609_v61 = vadd.f32 %v4089_v0, %v5508_v8 }
 0x1c1   : > { %v1552_v48 = vpop.f32.mrf.mxu1  ;;  %v1823_v9 = vpop.f32.mrf.mxu0 }
 0x1c2   : > { %5942 = vst [vmem:[#allocation16_spill] sm:$0xff] %v5602_v38  ;;  %v5605_v36 = vadd.f32 %v4137_v58, %v1609_v61  ;;  %v1607_v6 = vadd.f32 %v1552_v48, %v5511_v51 }
 0x1c3   : > { %v4090_v3 = vpop.f32.mrf.mxu1  ;;  %v4138_v5 = vpop.f32.mrf.mxu0 }
 0x1c4   : > { %v5608_v13 = vadd.f32 %v1823_v9, %v1607_v6  ;;  %v1610_v41 = vadd.f32 %v4090_v3, %v5514_v63 }
 0x1c5   : > { %v1555_v23 = vpop.f32.mrf.mxu1  ;;  %v1826_v21 = vpop.f32.mrf.mxu0 }
 0x1c6   : > { %5943 = vst [vmem:[#allocation17_spill] sm:$0xff] %v5608_v13  ;;  %v5611_v4 = vadd.f32 %v4138_v5, %v1610_v41  ;;  %v1608_v40 = vadd.f32 %v1555_v23, %v5518_v10 }
 0x1c7   : > { %v4093_v62 = vpop.f32.mrf.mxu1  ;;  %v4141_v8 = vpop.f32.mrf.mxu0 }
 0x1c8   : > { %5944 = vst [vmem:[#allocation18_spill] sm:$0xff] %v5611_v4  ;;  %v5614_v25 = vadd.f32 %v1826_v21, %v1608_v40  ;;  %v1613_v19 = vadd.f32 %v4093_v62, %v5521_v60 }
 0x1c9   : > { %v1568_v15 = vpop.f32.mrf.mxu1  ;;  %v1839_v51 = vpop.f32.mrf.mxu0 }
 0x1ca   : > { %5945 = vst [vmem:[#allocation19_spill] sm:$0xff] %v5614_v25  ;;  %v5617_v42 = vadd.f32 %v4141_v8, %v1613_v19  ;;  %v1611_v59 = vadd.f32 %v1568_v15, %v5524_v32 }
 0x1cb   : > { %v4094_v16 = vpop.f32.mrf.mxu1  ;;  %v4142_v63 = vpop.f32.mrf.mxu0 }
 0x1cc   : > { %v5620_v43 = vadd.f32 %v1839_v51, %v1611_v59  ;;  %v1614_v33 = vadd.f32 %v4094_v16, %v5527_v18 }
 0x1cd   : > { %v1571_v17 = vpop.f32.mrf.mxu1  ;;  %v1842_v10 = vpop.f32.mrf.mxu0 }
 0x1ce   : > { %5946 = vst [vmem:[#allocation20_spill] sm:$0xff] %v5620_v43  ;;  %v5623_v34 = vadd.f32 %v4142_v63, %v1614_v33  ;;  %v1612_v28 = vadd.f32 %v1571_v17, %v5530_v31 }
 0x1cf   : > { %v4161_v35 = vpop.f32.mrf.mxu1  ;;  %v4209_v60 = vpop.f32.mrf.mxu0 }
 0x1d0   : > { %5947 = vst [vmem:[#allocation21_spill] sm:$0xff] %v5623_v34  ;;  %v5626_v54 = vadd.f32 %v1842_v10, %v1612_v28  ;;  %v2114_v26 = vadd.f32 %v4161_v35, %v5533_v2 }
 0x1d1   : > { %v1985_v7 = vpop.f32.mrf.mxu1  ;;  %v2338_v32 = vpop.f32.mrf.mxu0 }
 0x1d2   : > { %5948 = vst [vmem:[#allocation22_spill] sm:$0xff] %v5626_v54  ;;  %v5629_v29 = vadd.f32 %v4209_v60, %v2114_v26  ;;  %v2112_v0 = vadd.f32 %v1985_v7, %v5536_v12 }
 0x1d3   : > { %v5632_v58 = vpop.f32.mrf.mxu1  ;;  %v5634_v18 = vpop.f32.mrf.mxu0 }
 0x1d4   : > { %v5636_v61 = vadd.f32 %v2338_v32, %v2112_v0 }
 0x1d5   : > { %v5638_v48 = vpop.f32.mrf.mxu1  ;;  %v5640_v31 = vpop.f32.mrf.mxu0 }
 0x1d7   : > { %v4165_v9 = vpop.f32.mrf.mxu1  ;;  %v4213_v6 = vpop.f32.mrf.mxu0 }
 0x1d8   : > { %v2118_v2 = vadd.f32 %v4165_v9, %v5545_v57 }
 0x1d9   : > { %v5643_v3 = vpop.f32.mrf.mxu1  ;;  %v5645_v5 = vpop.f32.mrf.mxu0 }
 0x1da   : > { %v5647_v41 = vadd.f32 %v4213_v6, %v2118_v2 }
 0x1db   : > { %v5649_v12 = vpop.f32.mrf.mxu1  ;;  %v5651_v23 = vpop.f32.mrf.mxu0 }
 0x1dd   : > { %v5653_v21 = vpop.f32.mrf.mxu1  ;;  %v5655_v40 = vpop.f32.mrf.mxu0 }
 0x1df   : > { %v4169_v62 = vpop.f32.mrf.mxu1  ;;  %v4217_v8 = vpop.f32.mrf.mxu0 }
 0x1e0   : > { %v2122_v19 = vadd.f32 %v4169_v62, %v5557_v47 }
 0x1e1   : > { %v5658_v15 = vpop.f32.mrf.mxu1  ;;  %v5660_v57 = vpop.f32.mrf.mxu0 }
 0x1e2   : > { %v5662_v51 = vadd.f32 %v4217_v8, %v2122_v19 }
 0x1e3   : > { %v5664_v59 = vpop.f32.mrf.mxu1  ;;  %v5666_v16 = vpop.f32.mrf.mxu0 }
 0x1e5   : > { %v5668_v63 = vpop.f32.mrf.mxu1  ;;  %v5670_v33 = vpop.f32.mrf.mxu0 }
 0x1e7   : > { %v4173_v17 = vpop.f32.mrf.mxu1  ;;  %v4221_v10 = vpop.f32.mrf.mxu0 }
 0x1e8   : > { %v2126_v28 = vadd.f32 %v4173_v17, %v5569_v46 }
 0x1e9   : > { %v5673_v35 = vpop.f32.mrf.mxu1  ;;  %v5675_v47 = vpop.f32.mrf.mxu0 }
 0x1ea   : > { %v5677_v60 = vadd.f32 %v4221_v10, %v2126_v28 }
 0x1eb   : > { %v5679_v26 = vpop.f32.mrf.mxu1  ;;  %v5681_v7 = vpop.f32.mrf.mxu0 }
 0x1ed   : > { %v5683_v32 = vpop.f32.mrf.mxu1  ;;  %v5685_v0 = vpop.f32.mrf.mxu0 }
 0x1ef   : > { %v4177_v9 = vpop.f32.mrf.mxu1  ;;  %v4225_v6 = vpop.f32.mrf.mxu0 }
 0x1f0   : > { %v2130_v2 = vadd.f32 %v4177_v9, %v5581_v52 }
 0x1f1   : > { %v5688_v62 = vpop.f32.mrf.mxu1  ;;  %v5690_v46 = vpop.f32.mrf.mxu0 }
 0x1f2   : > { %v5692_v8 = vadd.f32 %v4225_v6, %v2130_v2 }
 0x1f3   : > { %v5694_v19 = vpop.f32.mrf.mxu1  ;;  %v5696_v17 = vpop.f32.mrf.mxu0 }
 0x1f5   : > { %v5698_v10 = vpop.f32.mrf.mxu1  ;;  %v5700_v28 = vpop.f32.mrf.mxu0 }
 0x1f6   : > { %5949 = vst [vmem:[#allocation23_spill] sm:$0xff] %v5700_v28 }
 0x1f7   : > { %v4181_v54 = vpop.f32.mrf.mxu1  ;;  %v4229_v34 = vpop.f32.mrf.mxu0 }
 0x1f8   : > { %v2134_v43 = vadd.f32 %v4181_v54, %v5593_v14 }
 0x1f9   : > { %v5703_v25 = vpop.f32.mrf.mxu1  ;;  %v5705_v52 = vpop.f32.mrf.mxu0 }
 0x1fa   : > { %5950 = vst [vmem:[#allocation24_spill] sm:$0xff] %v5705_v52  ;;  %v5707_v9 = vadd.f32 %v4229_v34, %v2134_v43 }
 0x1fb   : > { %v5709_v6 = vpop.f32.mrf.mxu1  ;;  %v5711_v2 = vpop.f32.mrf.mxu0 }
 0x1fc   : > { %5951 = vst [vmem:[#allocation25_spill] sm:$0xff] %v5707_v9  ;;  %5952 = vst [vmem:[#allocation26_spill] sm:$0xff] %v5709_v6 }
 0x1fd   : > { %5953 = vst [vmem:[#allocation27_spill] sm:$0xff] %v5711_v2  ;;  %v5713_v4 = vpop.f32.mrf.mxu1  ;;  %v5715_v13 = vpop.f32.mrf.mxu0 }
 0x1fe   : > { %5954 = vst [vmem:[#allocation28_spill] sm:$0xff] %v5713_v4  ;;  %5955 = vst [vmem:[#allocation29_spill] sm:$0xff] %v5715_v13 }
 0x1ff   : > { %v4185_v38 = vpop.f32.mrf.mxu1  ;;  %v4233_v39 = vpop.f32.mrf.mxu0 }
 0x200   : > { %v2138_v11 = vadd.f32 %v4185_v38, %v5605_v36 }
 0x201   : > { %v5718_v28 = vpop.f32.mrf.mxu1  ;;  %v5720_v14 = vpop.f32.mrf.mxu0 }
 0x202   : > { %5956 = vst [vmem:[#allocation30_spill] sm:$0xff] %v5720_v14  ;;  %v5722_v54 = vadd.f32 %v4233_v39, %v2138_v11 }
 0x203   : > { %v5724_v43 = vpop.f32.mrf.mxu1  ;;  %v5726_v34 = vpop.f32.mrf.mxu0 }
 0x204   : > { %5957 = vst [vmem:[#allocation31_spill] sm:$0xff] %v5722_v54  ;;  %5958 = vst [vmem:[#allocation32_spill] sm:$0xff] %v5726_v34 }
 0x205   : > { %v5728_v9 = vpop.f32.mrf.mxu1  ;;  %v5730_v2 = vpop.f32.mrf.mxu0 }
 0x206   : > { %5959 = vst [vmem:[#allocation33_spill] sm:$0xff] %v5728_v9  ;;  %5960 = vst [vmem:[#allocation34_spill] sm:$0xff] %v5730_v2  ;;  %v2115_v2 = vadd.f32 %v5632_v58, %v5539_v44  ;;  %v2116_v44 = vadd.f32 %v5643_v3, %v5548_v30 }
 0x207   : > { %v4189_v4 = vpop.f32.mrf.mxu1  ;;  %v4237_v13 = vpop.f32.mrf.mxu0 }
 0x208   : > { %v2142_v52 = vadd.f32 %v4189_v4, %v5617_v42  ;;  %v2113_v42 = vadd.f32 %v5638_v48, %v5542_v1  ;;  %v2119_v1 = vadd.f32 %v5649_v12, %v5551_v53 }
 0x209   : > { %v5733_v6 = vpop.f32.mrf.mxu1  ;;  %v5735_v38 = vpop.f32.mrf.mxu0 }
 0x20a   : > { %5961 = vst [vmem:[#allocation35_spill] sm:$0xff] %v5733_v6  ;;  %5962 = vst [vmem:[#allocation36_spill] sm:$0xff] %v5735_v38  ;;  %v5737_v36 = vadd.f32 %v4237_v13, %v2142_v52  ;;  %v2468_v52 = vadd.f32 %v5634_v18, %v2115_v2  ;;  %v2472_v30 = vadd.f32 %v5651_v23, %v2119_v1 }
 0x20b   : > { %v5739_v11 = vpop.f32.mrf.mxu1  ;;  %v5741_v39 = vpop.f32.mrf.mxu0 }
 0x20c   : > { %5963 = vst [vmem:[#allocation37_spill] sm:$0xff] %v5737_v36  ;;  %5964 = vst [vmem:[#allocation38_spill] sm:$0xff] %v5739_v11 }
 0x20d   : > { %5965 = vst [vmem:[#allocation39_spill] sm:$0xff] %v5741_v39  ;;  %v5743_v54 = vpop.f32.mrf.mxu1  ;;  %v5745_v34 = vpop.f32.mrf.mxu0 }
 0x20e   : > { %5966 = vst [vmem:[#allocation40_spill] sm:$0xff] %v5743_v54  ;;  %5967 = vst [vmem:[#allocation41_spill] sm:$0xff] %v5745_v34  ;;  %v2466_v34 = vadd.f32 %v5640_v31, %v2113_v42  ;;  %v2469_v42 = vadd.f32 %v5645_v5, %v2116_v44  ;;  %v2120_v5 = vadd.f32 %v5658_v15, %v5560_v20 }
 0x20f   : > { %v4257_v9 = vpop.f32.mrf.mxu1  ;;  %v4305_v4 = vpop.f32.mrf.mxu0  ;;  %v2123_v44 = vadd.f32 %v5664_v59, %v5563_v37 }
 0x210   : > { %v2731_v36 = vadd.f32 %v4257_v9, %v5629_v29 }
 0x211   : > { %v2602_v38 = vpop.f32.mrf.mxu1  ;;  %v2860_v13 = vpop.f32.mrf.mxu0 }
 0x212   : > { %v2729_v39 = vadd.f32 %v2602_v38, %v5636_v61  ;;  %v2989_v14 = vadd.f32 %v4305_v4, %v2731_v36  ;;  %v2117_v61 = vadd.f32 %v5653_v21, %v5554_v56 }
 0x213   : > { %v4258_v11 = vpop.f32.mrf.mxu1  ;;  %v4306_v54 = vpop.f32.mrf.mxu0 }
 0x214   : > { %v2732_v6 = vadd.f32 %v4258_v11, %v2468_v52  ;;  %v2987_v18 = vadd.f32 %v2860_v13, %v2729_v39 }
 0x215   : > { %v2605_v58 = vpop.f32.mrf.mxu1  ;;  %v2863_v48 = vpop.f32.mrf.mxu0 }
 0x216   : > { %v2990_v2 = vadd.f32 %v4306_v54, %v2732_v6  ;;  %v2730_v29 = vadd.f32 %v2605_v58, %v2466_v34  ;;  %v3216_v52 = vmul.f32 %v2987_v18, %v2987_v18  ;;  %v2470_v54 = vadd.f32 %v5655_v40, %v2117_v61 }
 0x217   : > { %v4261_v9 = vpop.f32.mrf.mxu1  ;;  %v4309_v38 = vpop.f32.mrf.mxu0 }
 0x218   : > { %v3600_v31 = vpack.c.bf16 %v2990_v2, %v2989_v14  ;;  %v2988_v11 = vadd.f32 %v2863_v48, %v2730_v29  ;;  %v2735_v3 = vadd.f32 %v4261_v9, %v5647_v41  ;;  %v3218_v41 = vmul.f32 %v2989_v14, %v2989_v14 }
 0x219   : > { %v2618_v53 = vpop.f32.mrf.mxu1  ;;  %v2876_v12 = vpop.f32.mrf.mxu0  ;;  %v3219_v1 = vmul.f32 %v2990_v2, %v2990_v2  ;;  %v2473_v9 = vadd.f32 %v5660_v57, %v2120_v5  ;;  %v2124_v5 = vadd.f32 %v5673_v35, %v5572_v55 }
 0x21a   : > { %3672 = vst [vmem:[%s5765_s20 + $0x8] sm:$0xff] %v3600_v31   ;;  %v3595_v6 = vpack.c.bf16 %v2988_v11, %v2987_v18  ;;  %v3179_v56 = vadd.f32 %v2988_v11, %v2987_v18  ;;  %v3217_v21 = vmul.f32 %v2988_v11, %v2988_v11  ;;  %v2733_v34 = vadd.f32 %v2618_v53, %v2469_v42 }
 0x21b   : > { %v4262_v23 = vpop.f32.mrf.mxu1  ;;  %v4310_v36 = vpop.f32.mrf.mxu0  ;;  %v2993_v58 = vadd.f32 %v4309_v38, %v2735_v3  ;;  %v2477_v35 = vadd.f32 %v5675_v47, %v2124_v5 }
 0x21c   : > { %3596 = vst [vmem:[%s5765_s20] sm:$0xff] %v3595_v6   ;;  %v3180_v39 = vadd.f32 %v3179_v56, %v2989_v14  ;;  %v3248_v4 = vadd.f32 %v3217_v21, %v3216_v52  ;;  %v2736_v13 = vadd.f32 %v4262_v23, %v2472_v30  ;;  %v2991_v48 = vadd.f32 %v2876_v12, %v2733_v34 }
 0x21d   : > { %v2621_v18 = vpop.f32.mrf.mxu1  ;;  %v2879_v29 = vpop.f32.mrf.mxu0  ;;  %v2121_v14 = vadd.f32 %v5668_v63, %v5566_v45  ;;  %v2127_v34 = vadd.f32 %v5679_v26, %v5575_v22  ;;  %v2125_v22 = vadd.f32 %v5683_v32, %v5578_v50 }
 0x21e   : > { %v3249_v40 = vadd.f32 %v3248_v4, %v3218_v41  ;;  %v3181_v61 = vadd.f32 %v3180_v39, %v2990_v2  ;;  %v2994_v20 = vadd.f32 %v4310_v36, %v2736_v13  ;;  %v2734_v15 = vadd.f32 %v2621_v18, %v2470_v54 }
 0x21f   : > { %v4265_v31 = vpop.f32.mrf.mxu1  ;;  %v4313_v11 = vpop.f32.mrf.mxu0  ;;  %v3220_v30 = vmul.f32 %v2991_v48, %v2991_v48  ;;  %v2476_v2 = vadd.f32 %v5666_v16, %v2123_v44  ;;  %v2474_v54 = vadd.f32 %v5670_v33, %v2121_v14  ;;  %v3222_v16 = vmul.f32 %v2993_v58, %v2993_v58 }
 0x220   : > { %v3182_v42 = vadd.f32 %v3181_v61, %v2991_v48  ;;  %v3250_v37 = vadd.f32 %v3249_v40, %v3219_v1  ;;  %v3610_v59 = vpack.c.bf16 %v2994_v20, %v2993_v58  ;;  %v2992_v38 = vadd.f32 %v2879_v29, %v2734_v15 }
 0x221   : > { %v2634_v3 = vpop.f32.mrf.mxu1  ;;  %v2892_v53 = vpop.f32.mrf.mxu0  ;;  %v2739_v52 = vadd.f32 %v4265_v31, %v5662_v51  ;;  %v2480_v40 = vadd.f32 %v5681_v7, %v2127_v34  ;;  %v2478_v32 = vadd.f32 %v5685_v0, %v2125_v22  ;;  %v2128_v7 = vadd.f32 %v5688_v62, %v5584_v27 }
 0x222   : > { %v3251_v12 = vadd.f32 %v3250_v37, %v3220_v30  ;;  %3674 = vst [vmem:[%s5765_s20 + $0x18] sm:$0xff] %v3610_v59   ;;  %v2737_v57 = vadd.f32 %v2634_v3, %v2473_v9  ;;  %v3605_v6 = vpack.c.bf16 %v2992_v38, %v2991_v48  ;;  %v3183_v56 = vadd.f32 %v3182_v42, %v2992_v38 }
 0x223   : > { %v3221_v45 = vmul.f32 %v2992_v38, %v2992_v38  ;;  %v4266_v63 = vpop.f32.mrf.mxu1  ;;  %v4314_v21 = vpop.f32.mrf.mxu0  ;;  %v2997_v13 = vadd.f32 %v4313_v11, %v2739_v52  ;;  %v3223_v48 = vmul.f32 %v2994_v20, %v2994_v20  ;;  %v2131_v38 = vadd.f32 %v5694_v19, %v5587_v24 }
 0x224   : > { %v2740_v23 = vadd.f32 %v4266_v63, %v2476_v2  ;;  %3673 = vst [vmem:[%s5765_s20 + $0x10] sm:$0xff] %v3605_v6   ;;  %v3184_v36 = vadd.f32 %v3183_v56, %v2993_v58  ;;  %v2995_v51 = vadd.f32 %v2892_v53, %v2737_v57  ;;  %v2481_v62 = vadd.f32 %v5690_v46, %v2128_v7 }
 0x225   : > { %v3252_v41 = vadd.f32 %v3251_v12, %v3221_v45  ;;  %v2637_v39 = vpop.f32.mrf.mxu1  ;;  %v2895_v4 = vpop.f32.mrf.mxu0  ;;  %v3226_v53 = vmul.f32 %v2997_v13, %v2997_v13  ;;  %v2129_v24 = vadd.f32 %v5698_v10, %v5590_v49  ;;  %v2484_v34 = vadd.f32 %v5696_v17, %v2131_v38  ;;  %v5968_v10 = vld [vmem:[#allocation23_spill] sm:$0xff] }
 0x226   : > { %v2998_v44 = vadd.f32 %v4314_v21, %v2740_v23  ;;  %v2738_v1 = vadd.f32 %v2637_v39, %v2474_v54  ;;  %v3185_v18 = vadd.f32 %v3184_v36, %v2994_v20  ;;  %v3224_v15 = vmul.f32 %v2995_v51, %v2995_v51 }
 0x227   : > { %v3253_v33 = vadd.f32 %v3252_v41, %v3222_v16  ;;  %v4269_v29 = vpop.f32.mrf.mxu1  ;;  %v4317_v55 = vpop.f32.mrf.mxu0 }
 0x228   : > { %v3620_v26 = vpack.c.bf16 %v2998_v44, %v2997_v13  ;;  %v2996_v58 = vadd.f32 %v2895_v4, %v2738_v1  ;;  %v3186_v61 = vadd.f32 %v3185_v18, %v2995_v51  ;;  %v2743_v42 = vadd.f32 %v4269_v29, %v5677_v60  ;;  %v5969_v18 = vld [vmem:[#allocation14_spill] sm:$0xff]  ;;  %v5970_v29 = vld [vmem:[#allocation15_spill] sm:$0xff] }
 0x229   : > { %v3254_v9 = vadd.f32 %v3253_v33, %v3223_v48  ;;  %v2650_v14 = vpop.f32.mrf.mxu1  ;;  %v2908_v31 = vpop.f32.mrf.mxu0  ;;  %v3227_v63 = vmul.f32 %v2998_v44, %v2998_v44  ;;  %v2482_v33 = vadd.f32 %v5968_v10, %v2129_v24  ;;  %v2132_v17 = vadd.f32 %v5703_v25, %v5969_v18  ;;  %v5977_v24 = vld [vmem:[#allocation29_spill] sm:$0xff] }
 0x22a   : > { %3676 = vst [vmem:[%s5765_s20 + $0x28] sm:$0xff] %v3620_v26   ;;  %v3615_v11 = vpack.c.bf16 %v2996_v58, %v2995_v51  ;;  %v3225_v20 = vmul.f32 %v2996_v58, %v2996_v58  ;;  %v2741_v30 = vadd.f32 %v2650_v14, %v2477_v35  ;;  %v3187_v37 = vadd.f32 %v3186_v61, %v2996_v58 }
 0x22b   : > { %v3255_v47 = vadd.f32 %v3254_v9, %v3224_v15  ;;  %v4270_v59 = vpop.f32.mrf.mxu1  ;;  %v4318_v50 = vpop.f32.mrf.mxu0  ;;  %v3001_v6 = vadd.f32 %v4317_v55, %v2743_v42  ;;  %v5971_v55 = vld [vmem:[#allocation26_spill] sm:$0xff] }
 0x22c   : > { %3675 = vst [vmem:[%s5765_s20 + $0x20] sm:$0xff] %v3615_v11   ;;  %v2744_v3 = vadd.f32 %v4270_v59, %v2480_v40  ;;  %v3188_v2 = vadd.f32 %v3187_v37, %v2997_v13  ;;  %v2999_v52 = vadd.f32 %v2908_v31, %v2741_v30  ;;  %v2135_v35 = vadd.f32 %v5971_v55, %v5970_v29  ;;  %v5973_v59 = vld [vmem:[#allocation16_spill] sm:$0xff]  ;;  %v5982_v55 = vld [vmem:[#allocation33_spill] sm:$0xff] }
 0x22d   : > { %v3256_v12 = vadd.f32 %v3255_v47, %v3225_v20  ;;  %v2653_v60 = vpop.f32.mrf.mxu1  ;;  %v2911_v57 = vpop.f32.mrf.mxu0  ;;  %v3230_v26 = vmul.f32 %v3001_v6, %v3001_v6  ;;  %v5972_v47 = vld [vmem:[#allocation24_spill] sm:$0xff] }
 0x22e   : > { %v3002_v56 = vadd.f32 %v4318_v50, %v2744_v3  ;;  %v2742_v45 = vadd.f32 %v2653_v60, %v2478_v32  ;;  %v3189_v21 = vadd.f32 %v3188_v2, %v2998_v44  ;;  %v3228_v16 = vmul.f32 %v2999_v52, %v2999_v52  ;;  %v5974_v50 = vld [vmem:[#allocation28_spill] sm:$0xff]  ;;  %v5975_v3 = vld [vmem:[#allocation27_spill] sm:$0xff] }
 0x22f   : > { %v3257_v0 = vadd.f32 %v3256_v12, %v3226_v53  ;;  %v4273_v54 = vpop.f32.mrf.mxu1  ;;  %v4321_v27 = vpop.f32.mrf.mxu0  ;;  %v2485_v37 = vadd.f32 %v5972_v47, %v2132_v17  ;;  %v2133_v32 = vadd.f32 %v5974_v50, %v5973_v59  ;;  %v2488_v53 = vadd.f32 %v5975_v3, %v2135_v35  ;;  %v5980_v17 = vld [vmem:[#allocation30_spill] sm:$0xff] }
 0x230   : > { %v3630_v19 = vpack.c.bf16 %v3002_v56, %v3001_v6  ;;  %v3000_v5 = vadd.f32 %v2911_v57, %v2742_v45  ;;  %v3190_v23 = vadd.f32 %v3189_v21, %v2999_v52  ;;  %v2747_v13 = vadd.f32 %v4273_v54, %v5692_v8  ;;  %v5976_v45 = vld [vmem:[#allocation25_spill] sm:$0xff]  ;;  %v5985_v50 = vld [vmem:[#allocation34_spill] sm:$0xff] }
 0x231   : > { %v3258_v36 = vadd.f32 %v3257_v0, %v3227_v63  ;;  %v2666_v41 = vpop.f32.mrf.mxu1  ;;  %v2924_v51 = vpop.f32.mrf.mxu0  ;;  %v3231_v11 = vmul.f32 %v3002_v56, %v3002_v56 }
 0x232   : > { %3678 = vst [vmem:[%s5765_s20 + $0x38] sm:$0xff] %v3630_v19   ;;  %v3625_v39 = vpack.c.bf16 %v3000_v5, %v2999_v52  ;;  %v3229_v4 = vmul.f32 %v3000_v5, %v3000_v5  ;;  %v2745_v44 = vadd.f32 %v2666_v41, %v2481_v62  ;;  %v3191_v1 = vadd.f32 %v3190_v23, %v3000_v5  ;;  %v5978_v5 = vld [vmem:[#allocation17_spill] sm:$0xff]  ;;  %v5979_v23 = vld [vmem:[#allocation18_spill] sm:$0xff] }
 0x233   : > { %v3259_v46 = vadd.f32 %v3258_v36, %v3228_v16  ;;  %v4274_v48 = vpop.f32.mrf.mxu1  ;;  %v4322_v49 = vpop.f32.mrf.mxu0  ;;  %v3005_v9 = vadd.f32 %v4321_v27, %v2747_v13  ;;  %v2486_v19 = vadd.f32 %v5977_v24, %v2133_v32  ;;  %v2139_v16 = vadd.f32 %v5724_v43, %v5979_v23  ;;  %v5981_v43 = vld [vmem:[#allocation19_spill] sm:$0xff] }
 0x234   : > { %3677 = vst [vmem:[%s5765_s20 + $0x30] sm:$0xff] %v3625_v39   ;;  %v2748_v22 = vadd.f32 %v4274_v48, %v2484_v34  ;;  %v3192_v58 = vadd.f32 %v3191_v1, %v3001_v6  ;;  %v3003_v61 = vadd.f32 %v2924_v51, %v2745_v44  ;;  %v2136_v34 = vadd.f32 %v5718_v28, %v5978_v5 }
 0x235   : > { %v3260_v40 = vadd.f32 %v3259_v46, %v3229_v4  ;;  %v2669_v8 = vpop.f32.mrf.mxu1  ;;  %v2927_v15 = vpop.f32.mrf.mxu0  ;;  %v3234_v41 = vmul.f32 %v3005_v9, %v3005_v9  ;;  %v2137_v35 = vadd.f32 %v5982_v55, %v5981_v43 }
 0x236   : > { %v3006_v14 = vadd.f32 %v4322_v49, %v2748_v22  ;;  %v2746_v31 = vadd.f32 %v2669_v8, %v2482_v33  ;;  %v3193_v42 = vadd.f32 %v3192_v58, %v3002_v56  ;;  %v3232_v12 = vmul.f32 %v3003_v61, %v3003_v61  ;;  %v5983_v58 = vld [vmem:[#allocation32_spill] sm:$0xff] }
 0x237   : > { %v3261_v20 = vadd.f32 %v3260_v40, %v3230_v26  ;;  %v4277_v30 = vpop.f32.mrf.mxu1  ;;  %v4325_v25 = vpop.f32.mrf.mxu0  ;;  %v2489_v29 = vadd.f32 %v5980_v17, %v2136_v34  ;;  %v2492_v40 = vadd.f32 %v5983_v58, %v2139_v16  ;;  %v2490_v32 = vadd.f32 %v5985_v50, %v2137_v35  ;;  %v5990_v34 = vld [vmem:[#allocation36_spill] sm:$0xff]  ;;  %v5991_v16 = vld [vmem:[#allocation22_spill] sm:$0xff] }
 0x238   : > { %v3640_v7 = vpack.c.bf16 %v3006_v14, %v3005_v9  ;;  %v3004_v38 = vadd.f32 %v2927_v15, %v2746_v31  ;;  %v3194_v2 = vadd.f32 %v3193_v42, %v3003_v61  ;;  %v2751_v63 = vadd.f32 %v4277_v30, %v5976_v45 }
 0x239   : > { %v3262_v52 = vadd.f32 %v3261_v20, %v3231_v11  ;;  %v2682_v60 = vpop.f32.mrf.mxu1  ;;  %v2940_v57 = vpop.f32.mrf.mxu0  ;;  %v3235_v49 = vmul.f32 %v3006_v14, %v3006_v14  ;;  %v5984_v20 = vld [vmem:[#allocation31_spill] sm:$0xff] }
 0x23a   : > { %3680 = vst [vmem:[%s5765_s20 + $0x48] sm:$0xff] %v3640_v7   ;;  %v3635_v6 = vpack.c.bf16 %v3004_v38, %v3003_v61  ;;  %v3233_v56 = vmul.f32 %v3004_v38, %v3004_v38  ;;  %v2749_v0 = vadd.f32 %v2682_v60, %v2485_v37  ;;  %v3195_v54 = vadd.f32 %v3194_v2, %v3004_v38  ;;  %v5986_v7 = vld [vmem:[#allocation20_spill] sm:$0xff]  ;;  %v5987_v38 = vld [vmem:[#allocation35_spill] sm:$0xff]  ;;  %v5989_v2 = vld [vmem:[#allocation38_spill] sm:$0xff] }
 0x23b   : > { %v3263_v21 = vadd.f32 %v3262_v52, %v3232_v12  ;;  %v4278_v27 = vpop.f32.mrf.mxu1  ;;  %v4326_v62 = vpop.f32.mrf.mxu0  ;;  %v3009_v46 = vadd.f32 %v4325_v25, %v2751_v63  ;;  %v2140_v3 = vadd.f32 %v5987_v38, %v5986_v7 }
 0x23c   : > { %3679 = vst [vmem:[%s5765_s20 + $0x40] sm:$0xff] %v3635_v6   ;;  %v2752_v36 = vadd.f32 %v4278_v27, %v2488_v53  ;;  %v3196_v51 = vadd.f32 %v3195_v54, %v3005_v9  ;;  %v3007_v4 = vadd.f32 %v2940_v57, %v2749_v0  ;;  %v5988_v53 = vld [vmem:[#allocation21_spill] sm:$0xff] }
 0x23d   : > { %v3264_v39 = vadd.f32 %v3263_v21, %v3233_v56  ;;  %v2685_v13 = vpop.f32.mrf.mxu1  ;;  %v2943_v44 = vpop.f32.mrf.mxu0  ;;  %v2143_v12 = vadd.f32 %v5989_v2, %v5988_v53  ;;  %v3238_v60 = vmul.f32 %v3009_v46, %v3009_v46  ;;  %v2493_v23 = vadd.f32 %v5990_v34, %v2140_v3 }
 0x23e   : > { %v3010_v1 = vadd.f32 %v4326_v62, %v2752_v36  ;;  %v2750_v48 = vadd.f32 %v2685_v13, %v2486_v19  ;;  %v3197_v33 = vadd.f32 %v3196_v51, %v3006_v14  ;;  %v3236_v8 = vmul.f32 %v3007_v4, %v3007_v4  ;;  %v5992_v36 = vld [vmem:[#allocation40_spill] sm:$0xff] }
 0x23f   : > { %v3265_v10 = vadd.f32 %v3264_v39, %v3234_v41  ;;  %v4281_v18 = vpop.f32.mrf.mxu1  ;;  %v4329_v28 = vpop.f32.mrf.mxu0  ;;  %v2141_v41 = vadd.f32 %v5992_v36, %v5991_v16 }
 0x240   : > { %v3650_v22 = vpack.c.bf16 %v3010_v1, %v3009_v46  ;;  %v3008_v26 = vadd.f32 %v2943_v44, %v2750_v48  ;;  %v3198_v61 = vadd.f32 %v3197_v33, %v3007_v4  ;;  %v2755_v42 = vadd.f32 %v4281_v18, %v5984_v20  ;;  %v5994_v18 = vld [vmem:[#allocation37_spill] sm:$0xff] }
 0x241   : > { %v3266_v15 = vadd.f32 %v3265_v10, %v3235_v49  ;;  %v2698_v9 = vpop.f32.mrf.mxu1  ;;  %v2956_v31 = vpop.f32.mrf.mxu0  ;;  %v3239_v27 = vmul.f32 %v3010_v1, %v3010_v1 }
 0x242   : > { %3682 = vst [vmem:[%s5765_s20 + $0x58] sm:$0xff] %v3650_v22   ;;  %v3645_v11 = vpack.c.bf16 %v3008_v26, %v3007_v4  ;;  %v3237_v14 = vmul.f32 %v3008_v26, %v3008_v26  ;;  %v2753_v30 = vadd.f32 %v2698_v9, %v2489_v29  ;;  %v3199_v47 = vadd.f32 %v3198_v61, %v3008_v26  ;;  %v5993_v4 = vld [vmem:[#allocation39_spill] sm:$0xff]  ;;  %v5995_v22 = vld [vmem:[#allocation41_spill] sm:$0xff] }
 0x243   : > { %v3267_v25 = vadd.f32 %v3266_v15, %v3236_v8  ;;  %v4282_v37 = vpop.f32.mrf.mxu1  ;;  %v4330_v59 = vpop.f32.mrf.mxu0  ;;  %v3013_v0 = vadd.f32 %v4329_v28, %v2755_v42  ;;  %v2496_v13 = vadd.f32 %v5993_v4, %v2143_v12  ;;  %v2494_v26 = vadd.f32 %v5995_v22, %v2141_v41 }
 0x244   : > { %3681 = vst [vmem:[%s5765_s20 + $0x50] sm:$0xff] %v3645_v11   ;;  %v2756_v52 = vadd.f32 %v4282_v37, %v2492_v40  ;;  %v3200_v57 = vadd.f32 %v3199_v47, %v3009_v46  ;;  %v3011_v56 = vadd.f32 %v2956_v31, %v2753_v30 }
 0x245   : > { %v3268_v6 = vadd.f32 %v3267_v25, %v3237_v14  ;;  %v2701_v45 = vpop.f32.mrf.mxu1  ;;  %v2959_v63 = vpop.f32.mrf.mxu0  ;;  %v3242_v40 = vmul.f32 %v3013_v0, %v3013_v0 }
 0x246   : > { %v3014_v21 = vadd.f32 %v4330_v59, %v2756_v52  ;;  %v2754_v54 = vadd.f32 %v2701_v45, %v2490_v32  ;;  %v3201_v24 = vadd.f32 %v3200_v57, %v3010_v1  ;;  %v3240_v46 = vmul.f32 %v3011_v56, %v3011_v56 }
 0x247   : > { %v3269_v62 = vadd.f32 %v3268_v6, %v3238_v60  ;;  %v4285_v19 = vpop.f32.mrf.mxu1  ;;  %v4333_v5 = vpop.f32.mrf.mxu0 }
 0x248   : > { %v3660_v51 = vpack.c.bf16 %v3014_v21, %v3013_v0  ;;  %v3012_v39 = vadd.f32 %v2959_v63, %v2754_v54  ;;  %v3202_v44 = vadd.f32 %v3201_v24, %v3011_v56  ;;  %v2759_v28 = vadd.f32 %v4285_v19, %v5994_v18 }
 0x249   : > { %v3270_v48 = vadd.f32 %v3269_v62, %v3239_v27  ;;  %v2714_v49 = vpop.f32.mrf.mxu1  ;;  %v2972_v10 = vpop.f32.mrf.mxu0  ;;  %v3243_v20 = vmul.f32 %v3014_v21, %v3014_v21 }
 0x24a   : > { %3684 = vst [vmem:[%s5765_s20 + $0x68] sm:$0xff] %v3660_v51   ;;  %v3655_v33 = vpack.c.bf16 %v3012_v39, %v3011_v56  ;;  %v3241_v1 = vmul.f32 %v3012_v39, %v3012_v39  ;;  %v2757_v17 = vadd.f32 %v2714_v49, %v2493_v23  ;;  %v3203_v43 = vadd.f32 %v3202_v44, %v3012_v39 }
 0x24b   : > { %v3271_v29 = vadd.f32 %v3270_v48, %v3240_v46  ;;  %v4286_v55 = vpop.f32.mrf.mxu1  ;;  %v4334_v35 = vpop.f32.mrf.mxu0  ;;  %v3017_v31 = vadd.f32 %v4333_v5, %v2759_v28 }
 0x24c   : > { %3683 = vst [vmem:[%s5765_s20 + $0x60] sm:$0xff] %v3655_v33   ;;  %v2760_v58 = vadd.f32 %v4286_v55, %v2496_v13  ;;  %v3204_v61 = vadd.f32 %v3203_v43, %v3013_v0  ;;  %v3015_v15 = vadd.f32 %v2972_v10, %v2757_v17 }
 0x24d   : > { %v3272_v8 = vadd.f32 %v3271_v29, %v3241_v1  ;;  %v2717_v9 = vpop.f32.mrf.mxu1  ;;  %v2975_v25 = vpop.f32.mrf.mxu0  ;;  %v3246_v2 = vmul.f32 %v3017_v31, %v3017_v31 }
 0x24e   : > { %v3018_v11 = vadd.f32 %v4334_v35, %v2760_v58  ;;  %v2758_v14 = vadd.f32 %v2717_v9, %v2494_v26  ;;  %v3205_v30 = vadd.f32 %v3204_v61, %v3014_v21  ;;  %v3244_v50 = vmul.f32 %v3015_v15, %v3015_v15 }
 0x24f   : > { %v3273_v42 = vadd.f32 %v3272_v8, %v3242_v40 }
 0x250   : > { %v3670_v47 = vpack.c.bf16 %v3018_v11, %v3017_v31  ;;  %v3016_v37 = vadd.f32 %v2975_v25, %v2758_v14  ;;  %v3206_v59 = vadd.f32 %v3205_v30, %v3015_v15 }
 0x251   : > { %v3274_v32 = vadd.f32 %v3273_v42, %v3243_v20 }
 0x252   : > { %3686 = vst [vmem:[%s5765_s20 + $0x78] sm:$0xff] %v3670_v47   ;;  %v3665_v7 = vpack.c.bf16 %v3016_v37, %v3015_v15  ;;  %v3245_v38 = vmul.f32 %v3016_v37, %v3016_v37  ;;  %v3207_v53 = vadd.f32 %v3206_v59, %v3016_v37 }
 0x253   : > { %v3275_v3 = vadd.f32 %v3274_v32, %v3244_v50 }
 0x254   : > { %3685 = vst [vmem:[%s5765_s20 + $0x70] sm:$0xff] %v3665_v7   ;;  %v3208_v12 = vadd.f32 %v3207_v53, %v3017_v31 }
 0x255   : > { %v3276_v52 = vadd.f32 %v3275_v3, %v3245_v38 }
 0x256   : > { %4559 = shalt.err (!%p4556_p0)
}
 0x257   : > { %s4560_s11 = scalar_lea.hbm %s5847_s30, 2048  ;;  %s4564_s28 = scalar_lea.hbm %s5921_s2, 4096 }
 0x258   : > { %p4561_p5 = scmp.ne.s32.totalorder %s5847_s30, %s4560_s11  ;;  %p4565_p4 = scmp.lt.s32.totalorder %s5847_s30, %s5921_s2 }
 0x259   : > { %p4566_p6 = scmp.lt.s32.totalorder %s4564_s28, %s4560_s11 }
 0x25a   : > { %p4562_p9 = pnand %p4561_p5, %p5996_p11 }
 0x25b   : > { %p4567_p8 = por %p4566_p6, %p4565_p4 }
 0x25c   : > { %p4563_p1 = pneg %p4562_p9 }
 0x25e   : > { %p4568_p3 = pnand %p4567_p8, %p4563_p1 }
 0x260   : > { %4571 = shalt.err (!%p4568_p3)
}
 0x261   : > { %s4654_s20 = smov 64   ;;  %s4655_s17 = smov 4   ;;  %v3247_v60 = vmul.f32 %v3018_v11, %v3018_v11  ;;  %v3209_v57 = vadd.f32 %v3208_v12, %v3018_v11  ;;  %v3277_v6 = vadd.f32 %v3276_v52, %v3246_v2 }
 0x262   : > { %4357 = dma.vmem_to_hbm [thread:$0]  (%p5996_p11), %s5849_s22, 2048, %s5847_s30, %s3289_s4, %s4654_s20, %s4654_s20, %s4655_s17  }
 0x263   : > { %v3210_v56 = vrot.slane %v3209_v57, 4  ;;  %v3278_v45 = vadd.f32 %v3277_v6, %v3247_v60  ;;  %s3446_s23 = sshll.u32 %s4793_s26, 1  ;;  %s3555_s25 = sshll.u32 %s4698_s16, 5 }
 0x264   : > { %s214_s22 = scalar_lea.vmem [#allocation8], %s3446_s23  ;;  %s5881_s8 = scalar_lea.hbm %s5922_s3, %s3555_s25 }
 0x265   : > { %v3211_v63 = vadd.f32 %v3210_v56, %v3209_v57  ;;  %v3279_v0 = vrot.slane %v3278_v45, 4  ;;  %s3323_s30 = sshll.u32 %s214_s22, 4  ;;  %s3294_s9 = scalar_lea.sflag [#allocation9], %s4793_s26  ;;  %s3324_s30 = int_to_ptr.vmem [resolvable:$true] %s3323_s30 }
 0x266   : > { %s4572_s10 = scalar_lea.vmem %s3324_s30, 32  ;;  %s4656_s16 = smov [#allocation8]  }
 0x267   : > { %v3212_v21 = vrot.slane %v3211_v63, 2  ;;  %v3280_v54 = vadd.f32 %v3279_v0, %v3278_v45  ;;  %p4573_p7 = scmp.ne.s32.totalorder %s3324_s30, %s4572_s10  ;;  %s4576_s11 = sshll.u32 %s4656_s16, 4  ;;  %s4577_s11 = int_to_ptr.vmem [resolvable:$false] %s4576_s11 }
 0x268   : > { %s4578_s21 = scalar_lea.vmem %s4577_s11, 64  ;;  %p4579_p2 = scmp.lt.s32.totalorder %s3324_s30, %s4577_s11 }
 0x269   : > { %v3213_v27 = vadd.f32 %v3212_v21, %v3211_v63  ;;  %v3281_v62 = vrot.slane %v3280_v54, 2  ;;  %p4574_p12 = pnand %p4573_p7, %p5996_p11  ;;  %p4580_p13 = scmp.lt.s32.totalorder %s4578_s21, %s4572_s10 }
 0x26b   : > { %v3214_v24 = vrot.slane %v3213_v27, 1  ;;  %v3282_v19 = vadd.f32 %v3281_v62, %v3280_v54  ;;  %p4575_p10 = pneg %p4574_p12  ;;  %p4581_p0 = por %p4580_p13, %p4579_p2 }
 0x26d   : > { %v3283_v5 = vrot.slane %v3282_v19, 1  ;;  %v3215_v34 = vadd.f32 %v3214_v24, %v3213_v27  ;;  %p4582_p5 = pnand %p4581_p0, %p4575_p10 }
 0x26f   : > { %v3284_v23 = vadd.f32 %v3283_v5, %v3282_v19 }
 0x271   : > { %v3286_v16 = vsel %vm408_vm0, %v3215_v34, %v3284_v23 }
 0x272   : > { %3287 = vst [vmem:[%s214_s22] sm:$0x3] %v3286_v16 }
 0x273   : > { %4585 = shalt.err (!%p4582_p5)
}
 0x274   : > { %s4586_s27 = scalar_lea.hbm %s5881_s8, 32  ;;  %s4590_s29 = scalar_lea.hbm %s5922_s3, 64 }
 0x275   : > { %p4587_p9 = scmp.ne.s32.totalorder %s5881_s8, %s4586_s27  ;;  %p4591_p6 = scmp.lt.s32.totalorder %s5881_s8, %s5922_s3 }
 0x276   : > { %p4592_p8 = scmp.lt.s32.totalorder %s4590_s29, %s4586_s27 }
 0x277   : > { %p4588_p1 = pnand %p4587_p9, %p5996_p11 }
 0x278   : > { %p4593_p3 = por %p4592_p8, %p4591_p6 }
 0x279   : > { %p4589_p4 = pneg %p4588_p1 }
 0x27b   : > { %p4594_p7 = pnand %p4593_p3, %p4589_p4 }
 0x27d   : > { %4597 = shalt.err (!%p4594_p7)
}
 0x27e   : > { %4358 = dma.vmem_to_hbm [thread:$0]  (%p5996_p11), %s3324_s30, 32, %s5881_s8, %s3294_s9  }
 0x27f PF: > { %s3335_s17 = sand.u32 1, %s4632_s12   ;;  %p5997_p12 = scmp.ne.s32.totalorder %s5928_s19, 0 }
 0x280   : > { %p5998_p10 = scmp.ge.s32.totalorder %s4644_s15, 2  ;;  %s3336_s23 = scalar_lea.sflag [#allocation4], %s3335_s17 }
 0x282   : > { %p4370_p2 = pnand %p5998_p10, %p5997_p12 }
 0x284   : > { %p4371_p13 = pneg %p4370_p2 }
 0x286   : > { %4623 = dma.done.wait (%p4371_p13), %s3336_s23, 2048  }
 0x287   : > { %4625 = vsyncadd (%p4371_p13), %s3336_s23, 4294965248  ;;  %s3345_s25 = scalar_lea.sflag [#allocation9], %s3335_s17 }
 0x288   : > { %4627 = dma.done.wait (%p4371_p13), %s3345_s25, 32  }
 0x289   : > { %4629 = vsyncadd (%p4371_p13), %s3345_s25, 4294967264  ;;  %p21_p11 = scmp.ge.s32.totalorder %s4731_s24, 4   ;;  %s5999_s12 = smov %s4636_s13 }
 0x28a   : > { %s6000_s13 = smov %s4640_s14  ;;  %s6001_s14 = smov %s4748_s5 }
 0x28b   : > { %s6002_s15 = smov %s4731_s24  ;;  %23 = sbr.rel (!%p21_p11) target bundleno = 8 (0x8), region = 102 }
 0x290   :  { %3350 = vsyncpa [#allocation3], 1 }
 0x291   :  { %3352 = vsyncpa [#allocation3 + $0x1], 1 }
 0x292   :  { %3353 = vsyncpa [#allocation6], 1 }
 0x293   :  { %3354 = vsyncpa [#allocation4], 1 }
 0x294   :  { %3356 = vsyncpa [#allocation4 + $0x1], 1 }
 0x295   :  { %3357 = vsyncpa [#allocation9], 1 }
 0x296   :  { %3359 = vsyncpa [#allocation9 + $0x1], 1 }

</bundles_post_ra>
